<compile_context>
chip_gen: v7x
topology: tpu7x:2x2x1
jax: 0.10.0
libtpu: 0.0.40
codegen_flags: <defaults>
</compile_context>

<pallas_src>
import jax
import jax.numpy as jnp
from jax.experimental import pallas as pl
from jax.experimental.pallas import tpu as pltpu

INPUT_SIZE = 16
HIDDEN = 64          # nn.LSTM default hidden_size in the module
FC_HIDDEN = 32
OUTPUT = 6
OUT_PAD = 128        # lane-dense padded output width (sliced in the wrapper)
NUM_LAYERS = 2


def solar_lstm_kernel(x_ref,                    # (TC*B, I)  time-major chunk
                      wih0_ref, whh0_ref, b0_ref,   # (I,4H) (H,4H) (1,4H)
                      w1_ref, b1_ref,               # (2H,4H) (1,4H)
                      fw1_ref, fb1_ref,             # (H,FC)  (1,FC)
                      fw2_ref, fb2_ref,             # (FC,OUT_PAD) (1,OUT_PAD)
                      out_ref,                      # (B, OUT_PAD)
                      h1_s, c1_s, h2_s, c2_s,       # (B, H) state scratch
                      xproj_s):                     # (TC*B, 4H)
  chunk = pl.program_id(0)
  B, H = h1_s.shape
  TC = x_ref.shape[0] // B

  @pl.when(chunk == 0)
  def _():
    h1_s[...] = jnp.zeros_like(h1_s)
    c1_s[...] = jnp.zeros_like(c1_s)
    h2_s[...] = jnp.zeros_like(h2_s)
    c2_s[...] = jnp.zeros_like(c2_s)

  # Layer-0 input projection for every timestep of the chunk: one big MXU
  # matmul off the serial critical path (bias b0 folded in here).
  xproj_s[...] = (
      jnp.dot(x_ref[...], wih0_ref[...], preferred_element_type=jnp.float32)
      + b0_ref[...])

  # Hoisted loop invariants (JAX does not CSE broadcasts inside loops).
  whh0 = whh0_ref[...]
  w1 = w1_ref[...]
  b1 = jnp.broadcast_to(b1_ref[...], (B, 4 * H))

  def nonlin(gates, c_prev):
    # Gate order is (i, f, o, g): one sigmoid over 3H lanes + one tanh over H.
    s = jax.nn.sigmoid(gates[:, :3 * H])
    i_g = s[:, 0 * H:1 * H]
    f_g = s[:, 1 * H:2 * H]
    o_g = s[:, 2 * H:3 * H]
    g_g = jnp.tanh(gates[:, 3 * H:])
    c_new = f_g * c_prev + i_g * g_g
    h_new = o_g * jnp.tanh(c_new)
    return h_new, c_new

  def step(t, carry):
    h1, c1, h2, c2 = carry
    # Layer 0: only the recurrent matmul sits on the serial chain.
    g0 = xproj_s[pl.ds(t * B, B), :] + jnp.dot(
        h1, whh0, preferred_element_type=jnp.float32)
    h1, c1 = nonlin(g0, c1)
    # Layer 1: fused [x_t(=h1), h2] @ [W_ih1; W_hh1] — single MXU push, K=2H.
    g1 = jnp.dot(jnp.concatenate([h1, h2], axis=1), w1,
                 preferred_element_type=jnp.float32) + b1
    h2, c2 = nonlin(g1, c2)
    return h1, c1, h2, c2

  h1, c1, h2, c2 = jax.lax.fori_loop(
      0, TC, step,
      (h1_s[...], c1_s[...], h2_s[...], c2_s[...]),
      unroll=True)

  h1_s[...] = h1
  c1_s[...] = c1
  h2_s[...] = h2
  c2_s[...] = c2

  # Final chunk: FC head on the last hidden state of the top layer.
  @pl.when(chunk == pl.num_programs(0) - 1)
  def _():
    z = jnp.dot(h2, fw1_ref[...], preferred_element_type=jnp.float32) + fb1_ref[...]
    z = jnp.maximum(z, 0.0)
    out_ref[...] = (
        jnp.dot(z, fw2_ref[...], preferred_element_type=jnp.float32)
        + fb2_ref[...])


def _reorder_gates(w):
  """Reorder the 4H gate blocks from PyTorch (i, f, g, o) to (i, f, o, g)."""
  H = HIDDEN
  return jnp.concatenate([w[:2 * H], w[3 * H:], w[2 * H:3 * H]], axis=0)


@jax.jit
def solar_lstm_forward(x, params):
  """x: (B, T, input_size) float32, batch_first like PyTorch. Returns (B, OUTPUT)."""
  B, T, I = x.shape
  H = HIDDEN

  # Time-major, flattened over (T, B): rows are [t0b0, t0b1, t1b0, ...].
  x_tm = jnp.transpose(x, (1, 0, 2)).reshape(T * B, I)

  # Gate-reorder + pre-transpose weights to (in, out); fold the two LSTM biases.
  wih0_t = _reorder_gates(params["w_ih0"]).T                        # (I, 4H)
  whh0_t = _reorder_gates(params["w_hh0"]).T                        # (H, 4H)
  b0 = (_reorder_gates(params["b_ih0"])
        + _reorder_gates(params["b_hh0"])).reshape(1, 4 * H)
  w1cat = jnp.concatenate(
      [_reorder_gates(params["w_ih1"]).T,
       _reorder_gates(params["w_hh1"]).T], axis=0)                  # (2H, 4H)
  b1 = (_reorder_gates(params["b_ih1"])
        + _reorder_gates(params["b_hh1"])).reshape(1, 4 * H)
  fw1_t = params["fc_w1"].T                                         # (H, 32)
  fb1 = params["fc_b1"].reshape(1, FC_HIDDEN)
  # Lane-dense (128-wide) zero-padded FC-2 so the final store is unmasked.
  fw2_pad = jnp.zeros((FC_HIDDEN, OUT_PAD), jnp.float32)
  fw2_pad = fw2_pad.at[:, :OUTPUT].set(params["fc_w2"].T)
  fb2_pad = jnp.zeros((1, OUT_PAD), jnp.float32)
  fb2_pad = fb2_pad.at[:, :OUTPUT].set(params["fc_b2"])

  # One chunk = whole sequence VMEM-resident (tiny here). For very long
  # sequences raise num_chunks; the chunk block (tc*B, I) then needs tc*B % 8
  # == 0 to satisfy the (8,128) tiling rule.
  num_chunks = 1
  assert T % num_chunks == 0
  tc = T // num_chunks

  def whole(a):
    return pl.BlockSpec(a.shape, lambda c: (0, 0))

  grid_spec = pltpu.PrefetchScalarGridSpec(
      num_scalar_prefetch=0,
      grid=(num_chunks,),
      in_specs=[
          pl.BlockSpec((tc * B, I), lambda c: (c, 0)),   # time-major x chunk
          whole(wih0_t), whole(whh0_t), whole(b0),
          whole(w1cat), whole(b1),
          whole(fw1_t), whole(fb1), whole(fw2_pad), whole(fb2_pad),
      ],
      out_specs=pl.BlockSpec((B, OUT_PAD), lambda c: (0, 0)),
      scratch_shapes=[
          pltpu.VMEM((B, H), jnp.float32),            # h layer 0
          pltpu.VMEM((B, H), jnp.float32),            # c layer 0
          pltpu.VMEM((B, H), jnp.float32),            # h layer 1
          pltpu.VMEM((B, H), jnp.float32),            # c layer 1
          pltpu.VMEM((tc * B, 4 * H), jnp.float32),   # precomputed x @ W_ih0
      ],
  )

  out_pad = pl.pallas_call(
      solar_lstm_kernel,
      out_shape=jax.ShapeDtypeStruct((B, OUT_PAD), jnp.float32),
      grid_spec=grid_spec,
      compiler_params=pltpu.CompilerParams(
          dimension_semantics=("arbitrary",)),        # true time recurrence
  )(x_tm, wih0_t, whh0_t, b0, w1cat, b1, fw1_t, fb1, fw2_pad, fb2_pad)
  return out_pad[:, :OUTPUT]


def init_params(key, input_size=INPUT_SIZE, hidden=HIDDEN,
                fc_hidden=FC_HIDDEN, output=OUTPUT):
  """Deterministic parameter init (uniform, PyTorch-style bounds)."""
  ks = jax.random.split(key, 12)
  k_lstm = 1.0 / jnp.sqrt(hidden)

  def u(k, shape, bound):
    return jax.random.uniform(k, shape, jnp.float32, -bound, bound)

  return dict(
      w_ih0=u(ks[0], (4 * hidden, input_size), k_lstm),
      w_hh0=u(ks[1], (4 * hidden, hidden), k_lstm),
      b_ih0=u(ks[2], (4 * hidden,), k_lstm),
      b_hh0=u(ks[3], (4 * hidden,), k_lstm),
      w_ih1=u(ks[4], (4 * hidden, hidden), k_lstm),
      w_hh1=u(ks[5], (4 * hidden, hidden), k_lstm),
      b_ih1=u(ks[6], (4 * hidden,), k_lstm),
      b_hh1=u(ks[7], (4 * hidden,), k_lstm),
      fc_w1=u(ks[8], (fc_hidden, hidden), 1.0 / jnp.sqrt(hidden)),
      fc_b1=u(ks[9], (fc_hidden,), 1.0 / jnp.sqrt(hidden)),
      fc_w2=u(ks[10], (output, fc_hidden), 1.0 / jnp.sqrt(fc_hidden)),
      fc_b2=u(ks[11], (output,), 1.0 / jnp.sqrt(fc_hidden)),
  )


def reference_forward(x, params):
  """Pure-JAX reference matching nn.LSTM (gate order i,f,g,o) + FC head."""
  H = HIDDEN

  def layer(xs, w_ih, w_hh, b_ih, b_hh):
    def step(carry, x_t):
      h, c = carry
      g = x_t @ w_ih.T + b_ih + h @ w_hh.T + b_hh
      i = jax.nn.sigmoid(g[:, :H])
      f = jax.nn.sigmoid(g[:, H:2 * H])
      gg = jnp.tanh(g[:, 2 * H:3 * H])
      o = jax.nn.sigmoid(g[:, 3 * H:])
      c = f * c + i * gg
      h = o * jnp.tanh(c)
      return (h, c), h

    B = xs.shape[1]
    init = (jnp.zeros((B, H), jnp.float32), jnp.zeros((B, H), jnp.float32))
    _, hs = jax.lax.scan(step, init, xs)
    return hs

  xs = jnp.transpose(x, (1, 0, 2))
  h1 = layer(xs, params["w_ih0"], params["w_hh0"], params["b_ih0"], params["b_hh0"])
  h2 = layer(h1, params["w_ih1"], params["w_hh1"], params["b_ih1"], params["b_hh1"])
  last = h2[-1]
  z = jnp.maximum(last @ params["fc_w1"].T + params["fc_b1"], 0.0)
  return z @ params["fc_w2"].T + params["fc_b2"]


if __name__ == "__main__":
  key = jax.random.PRNGKey(0)
  k_x, k_p = jax.random.split(key)

  B, T = 2, 8
  x = jax.random.normal(k_x, (B, T, INPUT_SIZE), jnp.float32)
  params = init_params(k_p)

  out = jax.block_until_ready(solar_lstm_forward(x, params))

  ref = reference_forward(x, params)
  assert out.shape == (B, OUTPUT), out.shape
  assert jnp.allclose(out, ref, atol=1e-4, rtol=1e-4), (out, ref)

  print("KERNEL_OK")
</pallas_src>

<mosaic_0001>
module attributes {stable_mosaic.version = 11 : i64} {
  func.func @solar_lstm_kernel(%arg0: i32, %arg1: memref<16x16xf32, #tpu.memory_space<vmem>>, %arg2: memref<16x256xf32, #tpu.memory_space<vmem>>, %arg3: memref<64x256xf32, #tpu.memory_space<vmem>>, %arg4: memref<1x256xf32, #tpu.memory_space<vmem>>, %arg5: memref<128x256xf32, #tpu.memory_space<vmem>>, %arg6: memref<1x256xf32, #tpu.memory_space<vmem>>, %arg7: memref<64x32xf32, #tpu.memory_space<vmem>>, %arg8: memref<1x32xf32, #tpu.memory_space<vmem>>, %arg9: memref<32x128xf32, #tpu.memory_space<vmem>>, %arg10: memref<1x128xf32, #tpu.memory_space<vmem>>, %arg11: memref<2x128xf32, #tpu.memory_space<vmem>>, %arg12: memref<2x64xf32, #tpu.memory_space<vmem>>, %arg13: memref<2x64xf32, #tpu.memory_space<vmem>>, %arg14: memref<2x64xf32, #tpu.memory_space<vmem>>, %arg15: memref<2x64xf32, #tpu.memory_space<vmem>>, %arg16: memref<16x256xf32, #tpu.memory_space<vmem>>) attributes {dimension_semantics = [#tpu.dimension_semantics<arbitrary>], iteration_bounds = array<i64: 1>, scalar_prefetch = 0 : i64, scratch_operands = 5 : i64, tpu.core_type = #tpu.core_type<tc>, window_params = [{transform_indices = @transform_0, window_bounds = array<i64: 16, 16>}, {pipeline_mode = #tpu.pipeline_mode<synchronous>, transform_indices = @transform_1, window_bounds = array<i64: 16, 256>}, {pipeline_mode = #tpu.pipeline_mode<synchronous>, transform_indices = @transform_2, window_bounds = array<i64: 64, 256>}, {pipeline_mode = #tpu.pipeline_mode<synchronous>, transform_indices = @transform_3, window_bounds = array<i64: 1, 256>}, {pipeline_mode = #tpu.pipeline_mode<synchronous>, transform_indices = @transform_4, window_bounds = array<i64: 128, 256>}, {pipeline_mode = #tpu.pipeline_mode<synchronous>, transform_indices = @transform_5, window_bounds = array<i64: 1, 256>}, {pipeline_mode = #tpu.pipeline_mode<synchronous>, transform_indices = @transform_6, window_bounds = array<i64: 64, 32>}, {pipeline_mode = #tpu.pipeline_mode<synchronous>, transform_indices = @transform_7, window_bounds = array<i64: 1, 32>}, {pipeline_mode = #tpu.pipeline_mode<synchronous>, transform_indices = @transform_8, window_bounds = array<i64: 32, 128>}, {pipeline_mode = #tpu.pipeline_mode<synchronous>, transform_indices = @transform_9, window_bounds = array<i64: 1, 128>}, {pipeline_mode = #tpu.pipeline_mode<synchronous>, transform_indices = @transform_10, window_bounds = array<i64: 2, 128>}]} {
    %c0_i32 = arith.constant 0 : i32
    %0 = arith.cmpi eq, %arg0, %c0_i32 : i32
    %1 = arith.extui %0 : i1 to i32
    %c0_i32_0 = arith.constant 0 : i32
    %2 = arith.cmpi ne, %1, %c0_i32_0 : i32
    scf.if %2 {
      %cst_81 = arith.constant 0.000000e+00 : f32
      %346 = vector.broadcast %cst_81 : f32 to vector<2x64xf32>
      %c0_82 = arith.constant 0 : index
      %c0_83 = arith.constant 0 : index
      %347 = vector.load %arg12[%c0_82, %c0_83] : memref<2x64xf32, #tpu.memory_space<vmem>>, vector<2x64xf32>
      tpu.vector_store %arg12[%c0_82, %c0_83], %346 {strides = array<i32>} : memref<2x64xf32, #tpu.memory_space<vmem>>, vector<2x64xf32>,
      %cst_84 = arith.constant 0.000000e+00 : f32
      %348 = vector.broadcast %cst_84 : f32 to vector<2x64xf32>
      %c0_85 = arith.constant 0 : index
      %c0_86 = arith.constant 0 : index
      %349 = vector.load %arg13[%c0_85, %c0_86] : memref<2x64xf32, #tpu.memory_space<vmem>>, vector<2x64xf32>
      tpu.vector_store %arg13[%c0_85, %c0_86], %348 {strides = array<i32>} : memref<2x64xf32, #tpu.memory_space<vmem>>, vector<2x64xf32>,
      %cst_87 = arith.constant 0.000000e+00 : f32
      %350 = vector.broadcast %cst_87 : f32 to vector<2x64xf32>
      %c0_88 = arith.constant 0 : index
      %c0_89 = arith.constant 0 : index
      %351 = vector.load %arg14[%c0_88, %c0_89] : memref<2x64xf32, #tpu.memory_space<vmem>>, vector<2x64xf32>
      tpu.vector_store %arg14[%c0_88, %c0_89], %350 {strides = array<i32>} : memref<2x64xf32, #tpu.memory_space<vmem>>, vector<2x64xf32>,
      %cst_90 = arith.constant 0.000000e+00 : f32
      %352 = vector.broadcast %cst_90 : f32 to vector<2x64xf32>
      %c0_91 = arith.constant 0 : index
      %c0_92 = arith.constant 0 : index
      %353 = vector.load %arg15[%c0_91, %c0_92] : memref<2x64xf32, #tpu.memory_space<vmem>>, vector<2x64xf32>
      tpu.vector_store %arg15[%c0_91, %c0_92], %352 {strides = array<i32>} : memref<2x64xf32, #tpu.memory_space<vmem>>, vector<2x64xf32>,
    } else {
    }
    %c0 = arith.constant 0 : index
    %c0_1 = arith.constant 0 : index
    %3 = vector.load %arg1[%c0, %c0_1] : memref<16x16xf32, #tpu.memory_space<vmem>>, vector<16x16xf32>
    %c0_2 = arith.constant 0 : index
    %c0_3 = arith.constant 0 : index
    %4 = vector.load %arg2[%c0_2, %c0_3] : memref<16x256xf32, #tpu.memory_space<vmem>>, vector<16x256xf32>
    %cst = arith.constant dense<0.000000e+00> : vector<16x256xf32>
    %5 = tpu.matmul %3, %4, %cst {dimension_numbers = #tpu.dot_dimension_numbers<[1], [0], [0], [1], [0, 0, 1, 1], [], []>} : vector<16x16xf32>, vector<16x256xf32>, vector<16x256xf32> -> vector<16x256xf32>
    %c0_4 = arith.constant 0 : index
    %c0_5 = arith.constant 0 : index
    %6 = vector.load %arg4[%c0_4, %c0_5] : memref<1x256xf32, #tpu.memory_space<vmem>>, vector<1x256xf32>
    %7 = vector.broadcast %6 : vector<1x256xf32> to vector<16x256xf32>
    %8 = arith.addf %5, %7 : vector<16x256xf32>
    %c0_6 = arith.constant 0 : index
    %c0_7 = arith.constant 0 : index
    %9 = vector.load %arg16[%c0_6, %c0_7] : memref<16x256xf32, #tpu.memory_space<vmem>>, vector<16x256xf32>
    tpu.vector_store %arg16[%c0_6, %c0_7], %8 {strides = array<i32>} : memref<16x256xf32, #tpu.memory_space<vmem>>, vector<16x256xf32>,
    %c0_8 = arith.constant 0 : index
    %c0_9 = arith.constant 0 : index
    %10 = vector.load %arg3[%c0_8, %c0_9] : memref<64x256xf32, #tpu.memory_space<vmem>>, vector<64x256xf32>
    %c0_10 = arith.constant 0 : index
    %c0_11 = arith.constant 0 : index
    %11 = vector.load %arg5[%c0_10, %c0_11] : memref<128x256xf32, #tpu.memory_space<vmem>>, vector<128x256xf32>
    %c0_12 = arith.constant 0 : index
    %c0_13 = arith.constant 0 : index
    %12 = vector.load %arg6[%c0_12, %c0_13] : memref<1x256xf32, #tpu.memory_space<vmem>>, vector<1x256xf32>
    %13 = vector.shape_cast %12 : vector<1x256xf32> to vector<1x256xf32>
    %14 = vector.broadcast %13 : vector<1x256xf32> to vector<2x256xf32>
    %c0_14 = arith.constant 0 : index
    %c0_15 = arith.constant 0 : index
    %15 = vector.load %arg12[%c0_14, %c0_15] : memref<2x64xf32, #tpu.memory_space<vmem>>, vector<2x64xf32>
    %c0_16 = arith.constant 0 : index
    %c0_17 = arith.constant 0 : index
    %16 = vector.load %arg13[%c0_16, %c0_17] : memref<2x64xf32, #tpu.memory_space<vmem>>, vector<2x64xf32>
    %c0_18 = arith.constant 0 : index
    %c0_19 = arith.constant 0 : index
    %17 = vector.load %arg14[%c0_18, %c0_19] : memref<2x64xf32, #tpu.memory_space<vmem>>, vector<2x64xf32>
    %c0_20 = arith.constant 0 : index
    %c0_21 = arith.constant 0 : index
    %18 = vector.load %arg15[%c0_20, %c0_21] : memref<2x64xf32, #tpu.memory_space<vmem>>, vector<2x64xf32>
    %c0_i32_22 = arith.constant 0 : i32
    %c2_i32 = arith.constant 2 : i32
    %19 = arith.muli %c0_i32_22, %c2_i32 : i32
    %20 = arith.index_cast %19 : i32 to index
    %c0_23 = arith.constant 0 : index
    %21 = vector.load %arg16[%20, %c0_23] : memref<16x256xf32, #tpu.memory_space<vmem>>, vector<2x256xf32>
    %cst_24 = arith.constant dense<0.000000e+00> : vector<2x256xf32>
    %22 = tpu.matmul %15, %10, %cst_24 {dimension_numbers = #tpu.dot_dimension_numbers<[1], [0], [0], [1], [0, 0, 1, 1], [], []>} : vector<2x64xf32>, vector<64x256xf32>, vector<2x256xf32> -> vector<2x256xf32>
    %23 = arith.addf %21, %22 : vector<2x256xf32>
    %24 = vector.extract_strided_slice %23 {offsets = [0, 0], sizes = [2, 192], strides = [1, 1]} : vector<2x256xf32> to vector<2x192xf32>
    %25 = arith.negf %24 : vector<2x192xf32>
    %26 = math.exp %25 : vector<2x192xf32>
    %cst_25 = arith.constant 1.000000e+00 : f32
    %27 = vector.broadcast %cst_25 : f32 to vector<2x192xf32>
    %28 = arith.addf %27, %26 : vector<2x192xf32>
    %29 = arith.divf %27, %28 : vector<2x192xf32>
    %30 = vector.extract_strided_slice %29 {offsets = [0, 0], sizes = [2, 64], strides = [1, 1]} : vector<2x192xf32> to vector<2x64xf32>
    %31 = vector.extract_strided_slice %29 {offsets = [0, 64], sizes = [2, 64], strides = [1, 1]} : vector<2x192xf32> to vector<2x64xf32>
    %32 = vector.extract_strided_slice %29 {offsets = [0, 128], sizes = [2, 64], strides = [1, 1]} : vector<2x192xf32> to vector<2x64xf32>
    %33 = vector.extract_strided_slice %23 {offsets = [0, 192], sizes = [2, 64], strides = [1, 1]} : vector<2x256xf32> to vector<2x64xf32>
    %34 = math.tanh %33 : vector<2x64xf32>
    %35 = arith.mulf %31, %16 : vector<2x64xf32>
    %36 = arith.mulf %30, %34 : vector<2x64xf32>
    %37 = arith.addf %35, %36 : vector<2x64xf32>
    %38 = math.tanh %37 : vector<2x64xf32>
    %39 = arith.mulf %32, %38 : vector<2x64xf32>
    %40 = tpu.concatenate %39, %17 in 1 : vector<2x64xf32>, vector<2x64xf32> -> vector<2x128xf32>
    %cst_26 = arith.constant dense<0.000000e+00> : vector<2x256xf32>
    %41 = tpu.matmul %40, %11, %cst_26 {dimension_numbers = #tpu.dot_dimension_numbers<[1], [0], [0], [1], [0, 0, 1, 1], [], []>} : vector<2x128xf32>, vector<128x256xf32>, vector<2x256xf32> -> vector<2x256xf32>
    %42 = arith.addf %41, %14 : vector<2x256xf32>
    %43 = vector.extract_strided_slice %42 {offsets = [0, 0], sizes = [2, 192], strides = [1, 1]} : vector<2x256xf32> to vector<2x192xf32>
    %44 = arith.negf %43 : vector<2x192xf32>
    %45 = math.exp %44 : vector<2x192xf32>
    %cst_27 = arith.constant 1.000000e+00 : f32
    %46 = vector.broadcast %cst_27 : f32 to vector<2x192xf32>
    %47 = arith.addf %46, %45 : vector<2x192xf32>
    %48 = arith.divf %46, %47 : vector<2x192xf32>
    %49 = vector.extract_strided_slice %48 {offsets = [0, 0], sizes = [2, 64], strides = [1, 1]} : vector<2x192xf32> to vector<2x64xf32>
    %50 = vector.extract_strided_slice %48 {offsets = [0, 64], sizes = [2, 64], strides = [1, 1]} : vector<2x192xf32> to vector<2x64xf32>
    %51 = vector.extract_strided_slice %48 {offsets = [0, 128], sizes = [2, 64], strides = [1, 1]} : vector<2x192xf32> to vector<2x64xf32>
    %52 = vector.extract_strided_slice %42 {offsets = [0, 192], sizes = [2, 64], strides = [1, 1]} : vector<2x256xf32> to vector<2x64xf32>
    %53 = math.tanh %52 : vector<2x64xf32>
    %54 = arith.mulf %50, %18 : vector<2x64xf32>
    %55 = arith.mulf %49, %53 : vector<2x64xf32>
    %56 = arith.addf %54, %55 : vector<2x64xf32>
    %57 = math.tanh %56 : vector<2x64xf32>
    %58 = arith.mulf %51, %57 : vector<2x64xf32>
    %c1_i32 = arith.constant 1 : i32
    %c2_i32_28 = arith.constant 2 : i32
    %59 = arith.muli %c1_i32, %c2_i32_28 : i32
    %60 = arith.index_cast %59 : i32 to index
    %c0_29 = arith.constant 0 : index
    %61 = vector.load %arg16[%60, %c0_29] : memref<16x256xf32, #tpu.memory_space<vmem>>, vector<2x256xf32>
    %cst_30 = arith.constant dense<0.000000e+00> : vector<2x256xf32>
    %62 = tpu.matmul %39, %10, %cst_30 {dimension_numbers = #tpu.dot_dimension_numbers<[1], [0], [0], [1], [0, 0, 1, 1], [], []>} : vector<2x64xf32>, vector<64x256xf32>, vector<2x256xf32> -> vector<2x256xf32>
    %63 = arith.addf %61, %62 : vector<2x256xf32>
    %64 = vector.extract_strided_slice %63 {offsets = [0, 0], sizes = [2, 192], strides = [1, 1]} : vector<2x256xf32> to vector<2x192xf32>
    %65 = arith.negf %64 : vector<2x192xf32>
    %66 = math.exp %65 : vector<2x192xf32>
    %cst_31 = arith.constant 1.000000e+00 : f32
    %67 = vector.broadcast %cst_31 : f32 to vector<2x192xf32>
    %68 = arith.addf %67, %66 : vector<2x192xf32>
    %69 = arith.divf %67, %68 : vector<2x192xf32>
    %70 = vector.extract_strided_slice %69 {offsets = [0, 0], sizes = [2, 64], strides = [1, 1]} : vector<2x192xf32> to vector<2x64xf32>
    %71 = vector.extract_strided_slice %69 {offsets = [0, 64], sizes = [2, 64], strides = [1, 1]} : vector<2x192xf32> to vector<2x64xf32>
    %72 = vector.extract_strided_slice %69 {offsets = [0, 128], sizes = [2, 64], strides = [1, 1]} : vector<2x192xf32> to vector<2x64xf32>
    %73 = vector.extract_strided_slice %63 {offsets = [0, 192], sizes = [2, 64], strides = [1, 1]} : vector<2x256xf32> to vector<2x64xf32>
    %74 = math.tanh %73 : vector<2x64xf32>
    %75 = arith.mulf %71, %37 : vector<2x64xf32>
    %76 = arith.mulf %70, %74 : vector<2x64xf32>
    %77 = arith.addf %75, %76 : vector<2x64xf32>
    %78 = math.tanh %77 : vector<2x64xf32>
    %79 = arith.mulf %72, %78 : vector<2x64xf32>
    %80 = tpu.concatenate %79, %58 in 1 : vector<2x64xf32>, vector<2x64xf32> -> vector<2x128xf32>
    %cst_32 = arith.constant dense<0.000000e+00> : vector<2x256xf32>
    %81 = tpu.matmul %80, %11, %cst_32 {dimension_numbers = #tpu.dot_dimension_numbers<[1], [0], [0], [1], [0, 0, 1, 1], [], []>} : vector<2x128xf32>, vector<128x256xf32>, vector<2x256xf32> -> vector<2x256xf32>
    %82 = arith.addf %81, %14 : vector<2x256xf32>
    %83 = vector.extract_strided_slice %82 {offsets = [0, 0], sizes = [2, 192], strides = [1, 1]} : vector<2x256xf32> to vector<2x192xf32>
    %84 = arith.negf %83 : vector<2x192xf32>
    %85 = math.exp %84 : vector<2x192xf32>
    %cst_33 = arith.constant 1.000000e+00 : f32
    %86 = vector.broadcast %cst_33 : f32 to vector<2x192xf32>
    %87 = arith.addf %86, %85 : vector<2x192xf32>
    %88 = arith.divf %86, %87 : vector<2x192xf32>
    %89 = vector.extract_strided_slice %88 {offsets = [0, 0], sizes = [2, 64], strides = [1, 1]} : vector<2x192xf32> to vector<2x64xf32>
    %90 = vector.extract_strided_slice %88 {offsets = [0, 64], sizes = [2, 64], strides = [1, 1]} : vector<2x192xf32> to vector<2x64xf32>
    %91 = vector.extract_strided_slice %88 {offsets = [0, 128], sizes = [2, 64], strides = [1, 1]} : vector<2x192xf32> to vector<2x64xf32>
    %92 = vector.extract_strided_slice %82 {offsets = [0, 192], sizes = [2, 64], strides = [1, 1]} : vector<2x256xf32> to vector<2x64xf32>
    %93 = math.tanh %92 : vector<2x64xf32>
    %94 = arith.mulf %90, %56 : vector<2x64xf32>
    %95 = arith.mulf %89, %93 : vector<2x64xf32>
    %96 = arith.addf %94, %95 : vector<2x64xf32>
    %97 = math.tanh %96 : vector<2x64xf32>
    %98 = arith.mulf %91, %97 : vector<2x64xf32>
    %c2_i32_34 = arith.constant 2 : i32
    %c2_i32_35 = arith.constant 2 : i32
    %99 = arith.muli %c2_i32_34, %c2_i32_35 : i32
    %100 = arith.index_cast %99 : i32 to index
    %c0_36 = arith.constant 0 : index
    %101 = vector.load %arg16[%100, %c0_36] : memref<16x256xf32, #tpu.memory_space<vmem>>, vector<2x256xf32>
    %cst_37 = arith.constant dense<0.000000e+00> : vector<2x256xf32>
    %102 = tpu.matmul %79, %10, %cst_37 {dimension_numbers = #tpu.dot_dimension_numbers<[1], [0], [0], [1], [0, 0, 1, 1], [], []>} : vector<2x64xf32>, vector<64x256xf32>, vector<2x256xf32> -> vector<2x256xf32>
    %103 = arith.addf %101, %102 : vector<2x256xf32>
    %104 = vector.extract_strided_slice %103 {offsets = [0, 0], sizes = [2, 192], strides = [1, 1]} : vector<2x256xf32> to vector<2x192xf32>
    %105 = arith.negf %104 : vector<2x192xf32>
    %106 = math.exp %105 : vector<2x192xf32>
    %cst_38 = arith.constant 1.000000e+00 : f32
    %107 = vector.broadcast %cst_38 : f32 to vector<2x192xf32>
    %108 = arith.addf %107, %106 : vector<2x192xf32>
    %109 = arith.divf %107, %108 : vector<2x192xf32>
    %110 = vector.extract_strided_slice %109 {offsets = [0, 0], sizes = [2, 64], strides = [1, 1]} : vector<2x192xf32> to vector<2x64xf32>
    %111 = vector.extract_strided_slice %109 {offsets = [0, 64], sizes = [2, 64], strides = [1, 1]} : vector<2x192xf32> to vector<2x64xf32>
    %112 = vector.extract_strided_slice %109 {offsets = [0, 128], sizes = [2, 64], strides = [1, 1]} : vector<2x192xf32> to vector<2x64xf32>
    %113 = vector.extract_strided_slice %103 {offsets = [0, 192], sizes = [2, 64], strides = [1, 1]} : vector<2x256xf32> to vector<2x64xf32>
    %114 = math.tanh %113 : vector<2x64xf32>
    %115 = arith.mulf %111, %77 : vector<2x64xf32>
    %116 = arith.mulf %110, %114 : vector<2x64xf32>
    %117 = arith.addf %115, %116 : vector<2x64xf32>
    %118 = math.tanh %117 : vector<2x64xf32>
    %119 = arith.mulf %112, %118 : vector<2x64xf32>
    %120 = tpu.concatenate %119, %98 in 1 : vector<2x64xf32>, vector<2x64xf32> -> vector<2x128xf32>
    %cst_39 = arith.constant dense<0.000000e+00> : vector<2x256xf32>
    %121 = tpu.matmul %120, %11, %cst_39 {dimension_numbers = #tpu.dot_dimension_numbers<[1], [0], [0], [1], [0, 0, 1, 1], [], []>} : vector<2x128xf32>, vector<128x256xf32>, vector<2x256xf32> -> vector<2x256xf32>
    %122 = arith.addf %121, %14 : vector<2x256xf32>
    %123 = vector.extract_strided_slice %122 {offsets = [0, 0], sizes = [2, 192], strides = [1, 1]} : vector<2x256xf32> to vector<2x192xf32>
    %124 = arith.negf %123 : vector<2x192xf32>
    %125 = math.exp %124 : vector<2x192xf32>
    %cst_40 = arith.constant 1.000000e+00 : f32
    %126 = vector.broadcast %cst_40 : f32 to vector<2x192xf32>
    %127 = arith.addf %126, %125 : vector<2x192xf32>
    %128 = arith.divf %126, %127 : vector<2x192xf32>
    %129 = vector.extract_strided_slice %128 {offsets = [0, 0], sizes = [2, 64], strides = [1, 1]} : vector<2x192xf32> to vector<2x64xf32>
    %130 = vector.extract_strided_slice %128 {offsets = [0, 64], sizes = [2, 64], strides = [1, 1]} : vector<2x192xf32> to vector<2x64xf32>
    %131 = vector.extract_strided_slice %128 {offsets = [0, 128], sizes = [2, 64], strides = [1, 1]} : vector<2x192xf32> to vector<2x64xf32>
    %132 = vector.extract_strided_slice %122 {offsets = [0, 192], sizes = [2, 64], strides = [1, 1]} : vector<2x256xf32> to vector<2x64xf32>
    %133 = math.tanh %132 : vector<2x64xf32>
    %134 = arith.mulf %130, %96 : vector<2x64xf32>
    %135 = arith.mulf %129, %133 : vector<2x64xf32>
    %136 = arith.addf %134, %135 : vector<2x64xf32>
    %137 = math.tanh %136 : vector<2x64xf32>
    %138 = arith.mulf %131, %137 : vector<2x64xf32>
    %c3_i32 = arith.constant 3 : i32
    %c2_i32_41 = arith.constant 2 : i32
    %139 = arith.muli %c3_i32, %c2_i32_41 : i32
    %140 = arith.index_cast %139 : i32 to index
    %c0_42 = arith.constant 0 : index
    %141 = vector.load %arg16[%140, %c0_42] : memref<16x256xf32, #tpu.memory_space<vmem>>, vector<2x256xf32>
    %cst_43 = arith.constant dense<0.000000e+00> : vector<2x256xf32>
    %142 = tpu.matmul %119, %10, %cst_43 {dimension_numbers = #tpu.dot_dimension_numbers<[1], [0], [0], [1], [0, 0, 1, 1], [], []>} : vector<2x64xf32>, vector<64x256xf32>, vector<2x256xf32> -> vector<2x256xf32>
    %143 = arith.addf %141, %142 : vector<2x256xf32>
    %144 = vector.extract_strided_slice %143 {offsets = [0, 0], sizes = [2, 192], strides = [1, 1]} : vector<2x256xf32> to vector<2x192xf32>
    %145 = arith.negf %144 : vector<2x192xf32>
    %146 = math.exp %145 : vector<2x192xf32>
    %cst_44 = arith.constant 1.000000e+00 : f32
    %147 = vector.broadcast %cst_44 : f32 to vector<2x192xf32>
    %148 = arith.addf %147, %146 : vector<2x192xf32>
    %149 = arith.divf %147, %148 : vector<2x192xf32>
    %150 = vector.extract_strided_slice %149 {offsets = [0, 0], sizes = [2, 64], strides = [1, 1]} : vector<2x192xf32> to vector<2x64xf32>
    %151 = vector.extract_strided_slice %149 {offsets = [0, 64], sizes = [2, 64], strides = [1, 1]} : vector<2x192xf32> to vector<2x64xf32>
    %152 = vector.extract_strided_slice %149 {offsets = [0, 128], sizes = [2, 64], strides = [1, 1]} : vector<2x192xf32> to vector<2x64xf32>
    %153 = vector.extract_strided_slice %143 {offsets = [0, 192], sizes = [2, 64], strides = [1, 1]} : vector<2x256xf32> to vector<2x64xf32>
    %154 = math.tanh %153 : vector<2x64xf32>
    %155 = arith.mulf %151, %117 : vector<2x64xf32>
    %156 = arith.mulf %150, %154 : vector<2x64xf32>
    %157 = arith.addf %155, %156 : vector<2x64xf32>
    %158 = math.tanh %157 : vector<2x64xf32>
    %159 = arith.mulf %152, %158 : vector<2x64xf32>
    %160 = tpu.concatenate %159, %138 in 1 : vector<2x64xf32>, vector<2x64xf32> -> vector<2x128xf32>
    %cst_45 = arith.constant dense<0.000000e+00> : vector<2x256xf32>
    %161 = tpu.matmul %160, %11, %cst_45 {dimension_numbers = #tpu.dot_dimension_numbers<[1], [0], [0], [1], [0, 0, 1, 1], [], []>} : vector<2x128xf32>, vector<128x256xf32>, vector<2x256xf32> -> vector<2x256xf32>
    %162 = arith.addf %161, %14 : vector<2x256xf32>
    %163 = vector.extract_strided_slice %162 {offsets = [0, 0], sizes = [2, 192], strides = [1, 1]} : vector<2x256xf32> to vector<2x192xf32>
    %164 = arith.negf %163 : vector<2x192xf32>
    %165 = math.exp %164 : vector<2x192xf32>
    %cst_46 = arith.constant 1.000000e+00 : f32
    %166 = vector.broadcast %cst_46 : f32 to vector<2x192xf32>
    %167 = arith.addf %166, %165 : vector<2x192xf32>
    %168 = arith.divf %166, %167 : vector<2x192xf32>
    %169 = vector.extract_strided_slice %168 {offsets = [0, 0], sizes = [2, 64], strides = [1, 1]} : vector<2x192xf32> to vector<2x64xf32>
    %170 = vector.extract_strided_slice %168 {offsets = [0, 64], sizes = [2, 64], strides = [1, 1]} : vector<2x192xf32> to vector<2x64xf32>
    %171 = vector.extract_strided_slice %168 {offsets = [0, 128], sizes = [2, 64], strides = [1, 1]} : vector<2x192xf32> to vector<2x64xf32>
    %172 = vector.extract_strided_slice %162 {offsets = [0, 192], sizes = [2, 64], strides = [1, 1]} : vector<2x256xf32> to vector<2x64xf32>
    %173 = math.tanh %172 : vector<2x64xf32>
    %174 = arith.mulf %170, %136 : vector<2x64xf32>
    %175 = arith.mulf %169, %173 : vector<2x64xf32>
    %176 = arith.addf %174, %175 : vector<2x64xf32>
    %177 = math.tanh %176 : vector<2x64xf32>
    %178 = arith.mulf %171, %177 : vector<2x64xf32>
    %c4_i32 = arith.constant 4 : i32
    %c2_i32_47 = arith.constant 2 : i32
    %179 = arith.muli %c4_i32, %c2_i32_47 : i32
    %180 = arith.index_cast %179 : i32 to index
    %c0_48 = arith.constant 0 : index
    %181 = vector.load %arg16[%180, %c0_48] : memref<16x256xf32, #tpu.memory_space<vmem>>, vector<2x256xf32>
    %cst_49 = arith.constant dense<0.000000e+00> : vector<2x256xf32>
    %182 = tpu.matmul %159, %10, %cst_49 {dimension_numbers = #tpu.dot_dimension_numbers<[1], [0], [0], [1], [0, 0, 1, 1], [], []>} : vector<2x64xf32>, vector<64x256xf32>, vector<2x256xf32> -> vector<2x256xf32>
    %183 = arith.addf %181, %182 : vector<2x256xf32>
    %184 = vector.extract_strided_slice %183 {offsets = [0, 0], sizes = [2, 192], strides = [1, 1]} : vector<2x256xf32> to vector<2x192xf32>
    %185 = arith.negf %184 : vector<2x192xf32>
    %186 = math.exp %185 : vector<2x192xf32>
    %cst_50 = arith.constant 1.000000e+00 : f32
    %187 = vector.broadcast %cst_50 : f32 to vector<2x192xf32>
    %188 = arith.addf %187, %186 : vector<2x192xf32>
    %189 = arith.divf %187, %188 : vector<2x192xf32>
    %190 = vector.extract_strided_slice %189 {offsets = [0, 0], sizes = [2, 64], strides = [1, 1]} : vector<2x192xf32> to vector<2x64xf32>
    %191 = vector.extract_strided_slice %189 {offsets = [0, 64], sizes = [2, 64], strides = [1, 1]} : vector<2x192xf32> to vector<2x64xf32>
    %192 = vector.extract_strided_slice %189 {offsets = [0, 128], sizes = [2, 64], strides = [1, 1]} : vector<2x192xf32> to vector<2x64xf32>
    %193 = vector.extract_strided_slice %183 {offsets = [0, 192], sizes = [2, 64], strides = [1, 1]} : vector<2x256xf32> to vector<2x64xf32>
    %194 = math.tanh %193 : vector<2x64xf32>
    %195 = arith.mulf %191, %157 : vector<2x64xf32>
    %196 = arith.mulf %190, %194 : vector<2x64xf32>
    %197 = arith.addf %195, %196 : vector<2x64xf32>
    %198 = math.tanh %197 : vector<2x64xf32>
    %199 = arith.mulf %192, %198 : vector<2x64xf32>
    %200 = tpu.concatenate %199, %178 in 1 : vector<2x64xf32>, vector<2x64xf32> -> vector<2x128xf32>
    %cst_51 = arith.constant dense<0.000000e+00> : vector<2x256xf32>
    %201 = tpu.matmul %200, %11, %cst_51 {dimension_numbers = #tpu.dot_dimension_numbers<[1], [0], [0], [1], [0, 0, 1, 1], [], []>} : vector<2x128xf32>, vector<128x256xf32>, vector<2x256xf32> -> vector<2x256xf32>
    %202 = arith.addf %201, %14 : vector<2x256xf32>
    %203 = vector.extract_strided_slice %202 {offsets = [0, 0], sizes = [2, 192], strides = [1, 1]} : vector<2x256xf32> to vector<2x192xf32>
    %204 = arith.negf %203 : vector<2x192xf32>
    %205 = math.exp %204 : vector<2x192xf32>
    %cst_52 = arith.constant 1.000000e+00 : f32
    %206 = vector.broadcast %cst_52 : f32 to vector<2x192xf32>
    %207 = arith.addf %206, %205 : vector<2x192xf32>
    %208 = arith.divf %206, %207 : vector<2x192xf32>
    %209 = vector.extract_strided_slice %208 {offsets = [0, 0], sizes = [2, 64], strides = [1, 1]} : vector<2x192xf32> to vector<2x64xf32>
    %210 = vector.extract_strided_slice %208 {offsets = [0, 64], sizes = [2, 64], strides = [1, 1]} : vector<2x192xf32> to vector<2x64xf32>
    %211 = vector.extract_strided_slice %208 {offsets = [0, 128], sizes = [2, 64], strides = [1, 1]} : vector<2x192xf32> to vector<2x64xf32>
    %212 = vector.extract_strided_slice %202 {offsets = [0, 192], sizes = [2, 64], strides = [1, 1]} : vector<2x256xf32> to vector<2x64xf32>
    %213 = math.tanh %212 : vector<2x64xf32>
    %214 = arith.mulf %210, %176 : vector<2x64xf32>
    %215 = arith.mulf %209, %213 : vector<2x64xf32>
    %216 = arith.addf %214, %215 : vector<2x64xf32>
    %217 = math.tanh %216 : vector<2x64xf32>
    %218 = arith.mulf %211, %217 : vector<2x64xf32>
    %c5_i32 = arith.constant 5 : i32
    %c2_i32_53 = arith.constant 2 : i32
    %219 = arith.muli %c5_i32, %c2_i32_53 : i32
    %220 = arith.index_cast %219 : i32 to index
    %c0_54 = arith.constant 0 : index
    %221 = vector.load %arg16[%220, %c0_54] : memref<16x256xf32, #tpu.memory_space<vmem>>, vector<2x256xf32>
    %cst_55 = arith.constant dense<0.000000e+00> : vector<2x256xf32>
    %222 = tpu.matmul %199, %10, %cst_55 {dimension_numbers = #tpu.dot_dimension_numbers<[1], [0], [0], [1], [0, 0, 1, 1], [], []>} : vector<2x64xf32>, vector<64x256xf32>, vector<2x256xf32> -> vector<2x256xf32>
    %223 = arith.addf %221, %222 : vector<2x256xf32>
    %224 = vector.extract_strided_slice %223 {offsets = [0, 0], sizes = [2, 192], strides = [1, 1]} : vector<2x256xf32> to vector<2x192xf32>
    %225 = arith.negf %224 : vector<2x192xf32>
    %226 = math.exp %225 : vector<2x192xf32>
    %cst_56 = arith.constant 1.000000e+00 : f32
    %227 = vector.broadcast %cst_56 : f32 to vector<2x192xf32>
    %228 = arith.addf %227, %226 : vector<2x192xf32>
    %229 = arith.divf %227, %228 : vector<2x192xf32>
    %230 = vector.extract_strided_slice %229 {offsets = [0, 0], sizes = [2, 64], strides = [1, 1]} : vector<2x192xf32> to vector<2x64xf32>
    %231 = vector.extract_strided_slice %229 {offsets = [0, 64], sizes = [2, 64], strides = [1, 1]} : vector<2x192xf32> to vector<2x64xf32>
    %232 = vector.extract_strided_slice %229 {offsets = [0, 128], sizes = [2, 64], strides = [1, 1]} : vector<2x192xf32> to vector<2x64xf32>
    %233 = vector.extract_strided_slice %223 {offsets = [0, 192], sizes = [2, 64], strides = [1, 1]} : vector<2x256xf32> to vector<2x64xf32>
    %234 = math.tanh %233 : vector<2x64xf32>
    %235 = arith.mulf %231, %197 : vector<2x64xf32>
    %236 = arith.mulf %230, %234 : vector<2x64xf32>
    %237 = arith.addf %235, %236 : vector<2x64xf32>
    %238 = math.tanh %237 : vector<2x64xf32>
    %239 = arith.mulf %232, %238 : vector<2x64xf32>
    %240 = tpu.concatenate %239, %218 in 1 : vector<2x64xf32>, vector<2x64xf32> -> vector<2x128xf32>
    %cst_57 = arith.constant dense<0.000000e+00> : vector<2x256xf32>
    %241 = tpu.matmul %240, %11, %cst_57 {dimension_numbers = #tpu.dot_dimension_numbers<[1], [0], [0], [1], [0, 0, 1, 1], [], []>} : vector<2x128xf32>, vector<128x256xf32>, vector<2x256xf32> -> vector<2x256xf32>
    %242 = arith.addf %241, %14 : vector<2x256xf32>
    %243 = vector.extract_strided_slice %242 {offsets = [0, 0], sizes = [2, 192], strides = [1, 1]} : vector<2x256xf32> to vector<2x192xf32>
    %244 = arith.negf %243 : vector<2x192xf32>
    %245 = math.exp %244 : vector<2x192xf32>
    %cst_58 = arith.constant 1.000000e+00 : f32
    %246 = vector.broadcast %cst_58 : f32 to vector<2x192xf32>
    %247 = arith.addf %246, %245 : vector<2x192xf32>
    %248 = arith.divf %246, %247 : vector<2x192xf32>
    %249 = vector.extract_strided_slice %248 {offsets = [0, 0], sizes = [2, 64], strides = [1, 1]} : vector<2x192xf32> to vector<2x64xf32>
    %250 = vector.extract_strided_slice %248 {offsets = [0, 64], sizes = [2, 64], strides = [1, 1]} : vector<2x192xf32> to vector<2x64xf32>
    %251 = vector.extract_strided_slice %248 {offsets = [0, 128], sizes = [2, 64], strides = [1, 1]} : vector<2x192xf32> to vector<2x64xf32>
    %252 = vector.extract_strided_slice %242 {offsets = [0, 192], sizes = [2, 64], strides = [1, 1]} : vector<2x256xf32> to vector<2x64xf32>
    %253 = math.tanh %252 : vector<2x64xf32>
    %254 = arith.mulf %250, %216 : vector<2x64xf32>
    %255 = arith.mulf %249, %253 : vector<2x64xf32>
    %256 = arith.addf %254, %255 : vector<2x64xf32>
    %257 = math.tanh %256 : vector<2x64xf32>
    %258 = arith.mulf %251, %257 : vector<2x64xf32>
    %c6_i32 = arith.constant 6 : i32
    %c2_i32_59 = arith.constant 2 : i32
    %259 = arith.muli %c6_i32, %c2_i32_59 : i32
    %260 = arith.index_cast %259 : i32 to index
    %c0_60 = arith.constant 0 : index
    %261 = vector.load %arg16[%260, %c0_60] : memref<16x256xf32, #tpu.memory_space<vmem>>, vector<2x256xf32>
    %cst_61 = arith.constant dense<0.000000e+00> : vector<2x256xf32>
    %262 = tpu.matmul %239, %10, %cst_61 {dimension_numbers = #tpu.dot_dimension_numbers<[1], [0], [0], [1], [0, 0, 1, 1], [], []>} : vector<2x64xf32>, vector<64x256xf32>, vector<2x256xf32> -> vector<2x256xf32>
    %263 = arith.addf %261, %262 : vector<2x256xf32>
    %264 = vector.extract_strided_slice %263 {offsets = [0, 0], sizes = [2, 192], strides = [1, 1]} : vector<2x256xf32> to vector<2x192xf32>
    %265 = arith.negf %264 : vector<2x192xf32>
    %266 = math.exp %265 : vector<2x192xf32>
    %cst_62 = arith.constant 1.000000e+00 : f32
    %267 = vector.broadcast %cst_62 : f32 to vector<2x192xf32>
    %268 = arith.addf %267, %266 : vector<2x192xf32>
    %269 = arith.divf %267, %268 : vector<2x192xf32>
    %270 = vector.extract_strided_slice %269 {offsets = [0, 0], sizes = [2, 64], strides = [1, 1]} : vector<2x192xf32> to vector<2x64xf32>
    %271 = vector.extract_strided_slice %269 {offsets = [0, 64], sizes = [2, 64], strides = [1, 1]} : vector<2x192xf32> to vector<2x64xf32>
    %272 = vector.extract_strided_slice %269 {offsets = [0, 128], sizes = [2, 64], strides = [1, 1]} : vector<2x192xf32> to vector<2x64xf32>
    %273 = vector.extract_strided_slice %263 {offsets = [0, 192], sizes = [2, 64], strides = [1, 1]} : vector<2x256xf32> to vector<2x64xf32>
    %274 = math.tanh %273 : vector<2x64xf32>
    %275 = arith.mulf %271, %237 : vector<2x64xf32>
    %276 = arith.mulf %270, %274 : vector<2x64xf32>
    %277 = arith.addf %275, %276 : vector<2x64xf32>
    %278 = math.tanh %277 : vector<2x64xf32>
    %279 = arith.mulf %272, %278 : vector<2x64xf32>
    %280 = tpu.concatenate %279, %258 in 1 : vector<2x64xf32>, vector<2x64xf32> -> vector<2x128xf32>
    %cst_63 = arith.constant dense<0.000000e+00> : vector<2x256xf32>
    %281 = tpu.matmul %280, %11, %cst_63 {dimension_numbers = #tpu.dot_dimension_numbers<[1], [0], [0], [1], [0, 0, 1, 1], [], []>} : vector<2x128xf32>, vector<128x256xf32>, vector<2x256xf32> -> vector<2x256xf32>
    %282 = arith.addf %281, %14 : vector<2x256xf32>
    %283 = vector.extract_strided_slice %282 {offsets = [0, 0], sizes = [2, 192], strides = [1, 1]} : vector<2x256xf32> to vector<2x192xf32>
    %284 = arith.negf %283 : vector<2x192xf32>
    %285 = math.exp %284 : vector<2x192xf32>
    %cst_64 = arith.constant 1.000000e+00 : f32
    %286 = vector.broadcast %cst_64 : f32 to vector<2x192xf32>
    %287 = arith.addf %286, %285 : vector<2x192xf32>
    %288 = arith.divf %286, %287 : vector<2x192xf32>
    %289 = vector.extract_strided_slice %288 {offsets = [0, 0], sizes = [2, 64], strides = [1, 1]} : vector<2x192xf32> to vector<2x64xf32>
    %290 = vector.extract_strided_slice %288 {offsets = [0, 64], sizes = [2, 64], strides = [1, 1]} : vector<2x192xf32> to vector<2x64xf32>
    %291 = vector.extract_strided_slice %288 {offsets = [0, 128], sizes = [2, 64], strides = [1, 1]} : vector<2x192xf32> to vector<2x64xf32>
    %292 = vector.extract_strided_slice %282 {offsets = [0, 192], sizes = [2, 64], strides = [1, 1]} : vector<2x256xf32> to vector<2x64xf32>
    %293 = math.tanh %292 : vector<2x64xf32>
    %294 = arith.mulf %290, %256 : vector<2x64xf32>
    %295 = arith.mulf %289, %293 : vector<2x64xf32>
    %296 = arith.addf %294, %295 : vector<2x64xf32>
    %297 = math.tanh %296 : vector<2x64xf32>
    %298 = arith.mulf %291, %297 : vector<2x64xf32>
    %c7_i32 = arith.constant 7 : i32
    %c2_i32_65 = arith.constant 2 : i32
    %299 = arith.muli %c7_i32, %c2_i32_65 : i32
    %300 = arith.index_cast %299 : i32 to index
    %c0_66 = arith.constant 0 : index
    %301 = vector.load %arg16[%300, %c0_66] : memref<16x256xf32, #tpu.memory_space<vmem>>, vector<2x256xf32>
    %cst_67 = arith.constant dense<0.000000e+00> : vector<2x256xf32>
    %302 = tpu.matmul %279, %10, %cst_67 {dimension_numbers = #tpu.dot_dimension_numbers<[1], [0], [0], [1], [0, 0, 1, 1], [], []>} : vector<2x64xf32>, vector<64x256xf32>, vector<2x256xf32> -> vector<2x256xf32>
    %303 = arith.addf %301, %302 : vector<2x256xf32>
    %304 = vector.extract_strided_slice %303 {offsets = [0, 0], sizes = [2, 192], strides = [1, 1]} : vector<2x256xf32> to vector<2x192xf32>
    %305 = arith.negf %304 : vector<2x192xf32>
    %306 = math.exp %305 : vector<2x192xf32>
    %cst_68 = arith.constant 1.000000e+00 : f32
    %307 = vector.broadcast %cst_68 : f32 to vector<2x192xf32>
    %308 = arith.addf %307, %306 : vector<2x192xf32>
    %309 = arith.divf %307, %308 : vector<2x192xf32>
    %310 = vector.extract_strided_slice %309 {offsets = [0, 0], sizes = [2, 64], strides = [1, 1]} : vector<2x192xf32> to vector<2x64xf32>
    %311 = vector.extract_strided_slice %309 {offsets = [0, 64], sizes = [2, 64], strides = [1, 1]} : vector<2x192xf32> to vector<2x64xf32>
    %312 = vector.extract_strided_slice %309 {offsets = [0, 128], sizes = [2, 64], strides = [1, 1]} : vector<2x192xf32> to vector<2x64xf32>
    %313 = vector.extract_strided_slice %303 {offsets = [0, 192], sizes = [2, 64], strides = [1, 1]} : vector<2x256xf32> to vector<2x64xf32>
    %314 = math.tanh %313 : vector<2x64xf32>
    %315 = arith.mulf %311, %277 : vector<2x64xf32>
    %316 = arith.mulf %310, %314 : vector<2x64xf32>
    %317 = arith.addf %315, %316 : vector<2x64xf32>
    %318 = math.tanh %317 : vector<2x64xf32>
    %319 = arith.mulf %312, %318 : vector<2x64xf32>
    %320 = tpu.concatenate %319, %298 in 1 : vector<2x64xf32>, vector<2x64xf32> -> vector<2x128xf32>
    %cst_69 = arith.constant dense<0.000000e+00> : vector<2x256xf32>
    %321 = tpu.matmul %320, %11, %cst_69 {dimension_numbers = #tpu.dot_dimension_numbers<[1], [0], [0], [1], [0, 0, 1, 1], [], []>} : vector<2x128xf32>, vector<128x256xf32>, vector<2x256xf32> -> vector<2x256xf32>
    %322 = arith.addf %321, %14 : vector<2x256xf32>
    %323 = vector.extract_strided_slice %322 {offsets = [0, 0], sizes = [2, 192], strides = [1, 1]} : vector<2x256xf32> to vector<2x192xf32>
    %324 = arith.negf %323 : vector<2x192xf32>
    %325 = math.exp %324 : vector<2x192xf32>
    %cst_70 = arith.constant 1.000000e+00 : f32
    %326 = vector.broadcast %cst_70 : f32 to vector<2x192xf32>
    %327 = arith.addf %326, %325 : vector<2x192xf32>
    %328 = arith.divf %326, %327 : vector<2x192xf32>
    %329 = vector.extract_strided_slice %328 {offsets = [0, 0], sizes = [2, 64], strides = [1, 1]} : vector<2x192xf32> to vector<2x64xf32>
    %330 = vector.extract_strided_slice %328 {offsets = [0, 64], sizes = [2, 64], strides = [1, 1]} : vector<2x192xf32> to vector<2x64xf32>
    %331 = vector.extract_strided_slice %328 {offsets = [0, 128], sizes = [2, 64], strides = [1, 1]} : vector<2x192xf32> to vector<2x64xf32>
    %332 = vector.extract_strided_slice %322 {offsets = [0, 192], sizes = [2, 64], strides = [1, 1]} : vector<2x256xf32> to vector<2x64xf32>
    %333 = math.tanh %332 : vector<2x64xf32>
    %334 = arith.mulf %330, %296 : vector<2x64xf32>
    %335 = arith.mulf %329, %333 : vector<2x64xf32>
    %336 = arith.addf %334, %335 : vector<2x64xf32>
    %337 = math.tanh %336 : vector<2x64xf32>
    %338 = arith.mulf %331, %337 : vector<2x64xf32>
    %c8_i32 = arith.constant 8 : i32
    %c0_71 = arith.constant 0 : index
    %c0_72 = arith.constant 0 : index
    %339 = vector.load %arg12[%c0_71, %c0_72] : memref<2x64xf32, #tpu.memory_space<vmem>>, vector<2x64xf32>
    tpu.vector_store %arg12[%c0_71, %c0_72], %319 {strides = array<i32>} : memref<2x64xf32, #tpu.memory_space<vmem>>, vector<2x64xf32>,
    %c0_73 = arith.constant 0 : index
    %c0_74 = arith.constant 0 : index
    %340 = vector.load %arg13[%c0_73, %c0_74] : memref<2x64xf32, #tpu.memory_space<vmem>>, vector<2x64xf32>
    tpu.vector_store %arg13[%c0_73, %c0_74], %317 {strides = array<i32>} : memref<2x64xf32, #tpu.memory_space<vmem>>, vector<2x64xf32>,
    %c0_75 = arith.constant 0 : index
    %c0_76 = arith.constant 0 : index
    %341 = vector.load %arg14[%c0_75, %c0_76] : memref<2x64xf32, #tpu.memory_space<vmem>>, vector<2x64xf32>
    tpu.vector_store %arg14[%c0_75, %c0_76], %338 {strides = array<i32>} : memref<2x64xf32, #tpu.memory_space<vmem>>, vector<2x64xf32>,
    %c0_77 = arith.constant 0 : index
    %c0_78 = arith.constant 0 : index
    %342 = vector.load %arg15[%c0_77, %c0_78] : memref<2x64xf32, #tpu.memory_space<vmem>>, vector<2x64xf32>
    tpu.vector_store %arg15[%c0_77, %c0_78], %336 {strides = array<i32>} : memref<2x64xf32, #tpu.memory_space<vmem>>, vector<2x64xf32>,
    %c0_i32_79 = arith.constant 0 : i32
    %343 = arith.cmpi eq, %arg0, %c0_i32_79 : i32
    %344 = arith.extui %343 : i1 to i32
    %c0_i32_80 = arith.constant 0 : i32
    %345 = arith.cmpi ne, %344, %c0_i32_80 : i32
    scf.if %345 {
      %c0_81 = arith.constant 0 : index
      %c0_82 = arith.constant 0 : index
      %346 = vector.load %arg7[%c0_81, %c0_82] : memref<64x32xf32, #tpu.memory_space<vmem>>, vector<64x32xf32>
      %cst_83 = arith.constant dense<0.000000e+00> : vector<2x32xf32>
      %347 = tpu.matmul %338, %346, %cst_83 {dimension_numbers = #tpu.dot_dimension_numbers<[1], [0], [0], [1], [0, 0, 1, 1], [], []>} : vector<2x64xf32>, vector<64x32xf32>, vector<2x32xf32> -> vector<2x32xf32>
      %c0_84 = arith.constant 0 : index
      %c0_85 = arith.constant 0 : index
      %348 = vector.load %arg8[%c0_84, %c0_85] : memref<1x32xf32, #tpu.memory_space<vmem>>, vector<1x32xf32>
      %349 = vector.broadcast %348 : vector<1x32xf32> to vector<2x32xf32>
      %350 = arith.addf %347, %349 : vector<2x32xf32>
      %cst_86 = arith.constant 0.000000e+00 : f32
      %351 = vector.broadcast %cst_86 : f32 to vector<2x32xf32>
      %352 = arith.maximumf %350, %351 : vector<2x32xf32>
      %c0_87 = arith.constant 0 : index
      %c0_88 = arith.constant 0 : index
      %353 = vector.load %arg9[%c0_87, %c0_88] : memref<32x128xf32, #tpu.memory_space<vmem>>, vector<32x128xf32>
      %cst_89 = arith.constant dense<0.000000e+00> : vector<2x128xf32>
      %354 = tpu.matmul %352, %353, %cst_89 {dimension_numbers = #tpu.dot_dimension_numbers<[1], [0], [0], [1], [0, 0, 1, 1], [], []>} : vector<2x32xf32>, vector<32x128xf32>, vector<2x128xf32> -> vector<2x128xf32>
      %c0_90 = arith.constant 0 : index
      %c0_91 = arith.constant 0 : index
      %355 = vector.load %arg10[%c0_90, %c0_91] : memref<1x128xf32, #tpu.memory_space<vmem>>, vector<1x128xf32>
      %356 = vector.broadcast %355 : vector<1x128xf32> to vector<2x128xf32>
      %357 = arith.addf %354, %356 : vector<2x128xf32>
      %c0_92 = arith.constant 0 : index
      %c0_93 = arith.constant 0 : index
      %358 = vector.load %arg11[%c0_92, %c0_93] : memref<2x128xf32, #tpu.memory_space<vmem>>, vector<2x128xf32>
      tpu.vector_store %arg11[%c0_92, %c0_93], %357 {strides = array<i32>} : memref<2x128xf32, #tpu.memory_space<vmem>>, vector<2x128xf32>,
    } else {
    }
    return
  }
  func.func @transform_0(%arg0: i32) -> (i32, i32) {
    %c0_i32 = arith.constant 0 : i32
    %c0_i32_0 = arith.constant 0 : i32
    return %arg0, %c0_i32 : i32, i32
  }
  func.func @transform_1(%arg0: i32) -> (i32, i32) {
    %c0_i32 = arith.constant 0 : i32
    %c0_i32_0 = arith.constant 0 : i32
    %c0_i32_1 = arith.constant 0 : i32
    return %c0_i32, %c0_i32_0 : i32, i32
  }
  func.func @transform_2(%arg0: i32) -> (i32, i32) {
    %c0_i32 = arith.constant 0 : i32
    %c0_i32_0 = arith.constant 0 : i32
    %c0_i32_1 = arith.constant 0 : i32
    return %c0_i32, %c0_i32_0 : i32, i32
  }
  func.func @transform_3(%arg0: i32) -> (i32, i32) {
    %c0_i32 = arith.constant 0 : i32
    %c0_i32_0 = arith.constant 0 : i32
    %c0_i32_1 = arith.constant 0 : i32
    return %c0_i32, %c0_i32_0 : i32, i32
  }
  func.func @transform_4(%arg0: i32) -> (i32, i32) {
    %c0_i32 = arith.constant 0 : i32
    %c0_i32_0 = arith.constant 0 : i32
    %c0_i32_1 = arith.constant 0 : i32
    return %c0_i32, %c0_i32_0 : i32, i32
  }
  func.func @transform_5(%arg0: i32) -> (i32, i32) {
    %c0_i32 = arith.constant 0 : i32
    %c0_i32_0 = arith.constant 0 : i32
    %c0_i32_1 = arith.constant 0 : i32
    return %c0_i32, %c0_i32_0 : i32, i32
  }
  func.func @transform_6(%arg0: i32) -> (i32, i32) {
    %c0_i32 = arith.constant 0 : i32
    %c0_i32_0 = arith.constant 0 : i32
    %c0_i32_1 = arith.constant 0 : i32
    return %c0_i32, %c0_i32_0 : i32, i32
  }
  func.func @transform_7(%arg0: i32) -> (i32, i32) {
    %c0_i32 = arith.constant 0 : i32
    %c0_i32_0 = arith.constant 0 : i32
    %c0_i32_1 = arith.constant 0 : i32
    return %c0_i32, %c0_i32_0 : i32, i32
  }
  func.func @transform_8(%arg0: i32) -> (i32, i32) {
    %c0_i32 = arith.constant 0 : i32
    %c0_i32_0 = arith.constant 0 : i32
    %c0_i32_1 = arith.constant 0 : i32
    return %c0_i32, %c0_i32_0 : i32, i32
  }
  func.func @transform_9(%arg0: i32) -> (i32, i32) {
    %c0_i32 = arith.constant 0 : i32
    %c0_i32_0 = arith.constant 0 : i32
    %c0_i32_1 = arith.constant 0 : i32
    return %c0_i32, %c0_i32_0 : i32, i32
  }
  func.func @transform_10(%arg0: i32) -> (i32, i32) {
    %c0_i32 = arith.constant 0 : i32
    %c0_i32_0 = arith.constant 0 : i32
    %c0_i32_1 = arith.constant 0 : i32
    return %c0_i32, %c0_i32_0 : i32, i32
  }
}

</mosaic_0001>

<bundles_post_ra>
// kernel: solar_lstm_forward.1
= control target key start
LH: loop header
LB: loop body
LE: loop exit
PB: predicated region body
PF: predicated region fallthrough
CT: control target
= control target key end

     0   :  { %vm40_vm0 = vcmask 517120   ;;  %v2945_v7 = vmov 0.0   ;;  %vm63_vm1 = vcmask 130048   ;;  %s3684_s0 = inlined_call_operand.vmem [shape: f32[16,16], index: 0, kind: input, shape index: {}]   ;;  %s3685_s1 = inlined_call_operand.vmem [shape: f32[16,256], index: 1, kind: input, shape index: {}]   ;;  %s3686_s2 = inlined_call_operand.vmem [shape: f32[64,256], index: 2, kind: input, shape index: {}]   ;;  %s3687_s3 = inlined_call_operand.vmem [shape: f32[1,256], index: 3, kind: input, shape index: {}]   ;;  %s3688_s4 = inlined_call_operand.vmem [shape: f32[128,256], index: 4, kind: input, shape index: {}]   ;;  %s3689_s5 = inlined_call_operand.vmem [shape: f32[1,256], index: 5, kind: input, shape index: {}]   ;;  %s3690_s6 = inlined_call_operand.vmem [shape: f32[64,32], index: 6, kind: input, shape index: {}]   ;;  %s3691_s7 = inlined_call_operand.vmem [shape: f32[1,32], index: 7, kind: input, shape index: {}]   ;;  %s3692_s8 = inlined_call_operand.vmem [shape: f32[32,128], index: 8, kind: input, shape index: {}]   ;;  %s3693_s9 = inlined_call_operand.vmem [shape: f32[1,128], index: 9, kind: input, shape index: {}]   ;;  %s3694_s10 = inlined_call_operand.hbm [shape: f32[2,128], index: 10, kind: output, shape index: {}]  }
   0x1   :  { %v152_v0 = vld [vmem:[%s3686_s2 + $0x8] sm:$0xff]  ;;  %v154_v1 = vld [vmem:[%s3686_s2 + $0x18] sm:$0xff]  ;;  %v151_v5 = vld [vmem:[%s3686_s2] sm:$0xff]  ;;  %134 = vmatprep.mubr.f32.mxu0 %v2945_v7  ;;  %285 = vmatprep.mubr.f32.mxu1 %v2945_v7  ;;  %41 = vst.msk [vmem:[#allocation2] sm:$0x3] %vm40_vm0, %v2945_v7 }
   0x2   :  { %v48_v2 = vld [vmem:[%s3685_s1 + $0x8] sm:$0xff]  ;;  %v3014_v3 = vpack.c.bf16 %v154_v1, %v152_v0  ;;  %v50_v4 = vld [vmem:[%s3685_s1 + $0x18] sm:$0xff]  ;;  %v153_v6 = vld [vmem:[%s3686_s2 + $0x10] sm:$0xff]  ;;  %42 = vst.msk [vmem:[#allocation3] sm:$0x3] %vm40_vm0, %v2945_v7 }
   0x3   :  { %43 = vst.msk [vmem:[#allocation4] sm:$0x3] %vm40_vm0, %v2945_v7  ;;  %44 = vst.msk [vmem:[#allocation5] sm:$0x3] %vm40_vm0, %v2945_v7  ;;  %v2318_v8 = vpack.c.bf16 %v50_v4, %v48_v2  ;;  %v3035_v9 = vpack.c.bf16 %v153_v6, %v151_v5  ;;  %v47_v10 = vld [vmem:[%s3685_s1] sm:$0xff]  ;;  %v49_v11 = vld [vmem:[%s3685_s1 + $0x10] sm:$0xff] }
   0x4   :  { %v156_v12 = vld [vmem:[%s3686_s2 + $0x28] sm:$0xff]  ;;  %2323 = vmatprep.subr.bf16.mxu1 %v3014_v3  ;;  %v2320_v13 = vpack.c.bf16 %v49_v11, %v47_v10  ;;  %v158_v14 = vld [vmem:[%s3686_s2 + $0x38] sm:$0xff]  ;;  %v155_v15 = vld [vmem:[%s3686_s2 + $0x20] sm:$0xff] }
   0x5   :  { %2319 = vmatprep.subr.bf16.mxu0 %v2318_v8  ;;  %2325 = vmatpush1.bf16.msra.mxu1 %v3035_v9  ;;  %v3054_v16 = vpack.c.bf16 %v158_v14, %v156_v12  ;;  %v157_v17 = vld [vmem:[%s3686_s2 + $0x30] sm:$0xff]  ;;  %v160_v18 = vld [vmem:[%s3686_s2 + $0x48] sm:$0xff]  ;;  %v162_v19 = vld [vmem:[%s3686_s2 + $0x58] sm:$0xff] }
   0x6   :  { %2321 = vmatpush1.bf16.msra.mxu0 %v2320_v13  ;;  %v45_v20 = vld [vmem:[%s3684_s0] sm:$0xff]  ;;  %v3068_v21 = vpack.c.bf16 %v157_v17, %v155_v15  ;;  %v3070_v22 = vpack.c.bf16 %v162_v19, %v160_v18  ;;  %v161_v24 = vld [vmem:[%s3686_s2 + $0x50] sm:$0xff]  ;;  %v164_v25 = vld [vmem:[%s3686_s2 + $0x68] sm:$0xff] }
   0x7   :  { %v159_v23 = vld [vmem:[%s3686_s2 + $0x40] sm:$0xff]  ;;  %2327 = vmatprep.subr.bf16.mxu1 %v3054_v16  ;;  %v166_v26 = vld [vmem:[%s3686_s2 + $0x78] sm:$0xff] }
   0x8   :  { %15 = vsyncpa [#allocation8], 0  ;;  %v3087_v27 = vpack.c.bf16 %v161_v24, %v159_v23  ;;  %v3090_v28 = vpack.c.bf16 %v166_v26, %v164_v25  ;;  %v163_v29 = vld [vmem:[%s3686_s2 + $0x60] sm:$0xff]  ;;  %v165_v30 = vld [vmem:[%s3686_s2 + $0x70] sm:$0xff]  ;;  %vm217_vm2 = vcmask 523264   ;;  %v53_v33 = vlaneseq  ;;  %s2949_s14 = smov [#allocation7]  }
   0x9   :  { %2228 = vmatmul.mubr.msk.f32.vlgmr.msra.gmra.mrb[0].mxu0 %vm63_vm1, %v45_v20  ;;  %2329 = vmatpush1.bf16.msra.mxu1 %v3068_v21  ;;  %v3100_v31 = vpack.c.bf16 %v165_v30, %v163_v29  ;;  %v211_v32 = vld [vmem:[#allocation2] sm:$0x3]  ;;  %v212_v49 = vld [vmem:[#allocation3] sm:$0x3]  ;;  %v168_v59 = vld [vmem:[%s3688_s4 + $0x8] sm:$0xff]  ;;  %vm2022_vm3 = vcmask 523270  }
   0xa   :  { %2331 = vmatprep.subr.bf16.mxu1 %v3070_v22  ;;  %140 = vmatprep.mubr.f32.mxu0 %v2945_v7  ;;  %v3114_v34 = vshrl.u32 %v53_v33, 7  ;;  %v51_v36 = vld [vmem:[%s3687_s3] sm:$0x3]  ;;  %s2946_s3 = smov 64   ;;  %v213_v58 = vld [vmem:[#allocation4] sm:$0x3] }
   0xb   :  { %v170_v60 = vld [vmem:[%s3688_s4 + $0x18] sm:$0xff]  ;;  %v167_v62 = vld [vmem:[%s3688_s4] sm:$0xff]  ;;  %v169_v63 = vld [vmem:[%s3688_s4 + $0x10] sm:$0xff]  ;;  %vm2948_vm4 = vmmov 0   ;;  %vm2139_vm5 = vcmask 261120   ;;  %s2220_s1 = sshll.u32 %s2949_s14, 4  ;;  %s2221_s1 = int_to_ptr.vmem [resolvable:$true] %s2220_s1 }
   0xc   :  { %v55_v35 = vsub.s32 0, %v3114_v34  ;;  %v59_v37 = vsub.s32 1, %v3114_v34  ;;  %v3147_v61 = vpack.c.bf16 %v170_v60, %v168_v59  ;;  %v172_v0 = vld [vmem:[%s3688_s4 + $0x28] sm:$0xff]  ;;  %v3158_v1 = vpack.c.bf16 %v169_v63, %v167_v62  ;;  %v174_v2 = vld [vmem:[%s3688_s4 + $0x38] sm:$0xff]  ;;  %v171_v4 = vld [vmem:[%s3688_s4 + $0x20] sm:$0xff]  ;;  %p2926_p1 = scmp.lt.s32.totalorder %s2221_s1, %s2221_s1 }
   0xd   :  { %2333 = vmatpush1.bf16.msra.mxu1 %v3087_v27  ;;  %v173_v5 = vld [vmem:[%s3688_s4 + $0x30] sm:$0xff]  ;;  %v3170_v6 = vpack.c.bf16 %v174_v2, %v172_v0  ;;  %v176_v8 = vld [vmem:[%s3688_s4 + $0x48] sm:$0xff]  ;;  %v178_v10 = vld [vmem:[%s3688_s4 + $0x58] sm:$0xff] }
   0xe   :  { %2335 = vmatprep.subr.bf16.mxu1 %v3090_v28  ;;  %v3123_v38 = vrot.slane %v51_v36, %v55_v35  ;;  %v3127_v39 = vrot.slane %v51_v36, %v59_v37  ;;  %2339 = vmatprep.subr.bf16.mxu0 %v3147_v61  ;;  %v3180_v11 = vpack.c.bf16 %v173_v5, %v171_v4  ;;  %v175_v13 = vld [vmem:[%s3688_s4 + $0x40] sm:$0xff]  ;;  %v177_v14 = vld [vmem:[%s3688_s4 + $0x50] sm:$0xff]  ;;  %v180_v15 = vld [vmem:[%s3688_s4 + $0x68] sm:$0xff] }
   0xf   :  { %2341 = vmatpush1.bf16.msra.mxu0 %v3158_v1  ;;  %v3183_v12 = vpack.c.bf16 %v178_v10, %v176_v8  ;;  %v182_v17 = vld [vmem:[%s3688_s4 + $0x78] sm:$0xff]  ;;  %v3198_v18 = vpack.c.bf16 %v177_v14, %v175_v13  ;;  %v179_v20 = vld [vmem:[%s3688_s4 + $0x60] sm:$0xff]  ;;  %v181_v23 = vld [vmem:[%s3688_s4 + $0x70] sm:$0xff] }
  0x10   :  { %2343 = vmatprep.subr.bf16.mxu0 %v3170_v6  ;;  %v3201_v19 = vpack.c.bf16 %v182_v17, %v180_v15  ;;  %v46_v24 = vld [vmem:[%s3684_s0 + $0x8] sm:$0xff]  ;;  %v186_v26 = vld [vmem:[%s3688_s4 + $0x98] sm:$0xff]  ;;  %v3221_v29 = vpack.c.bf16 %v181_v23, %v179_v20  ;;  %v185_v33 = vld [vmem:[%s3688_s4 + $0x90] sm:$0xff] }
  0x11   :  { %2337 = vmatpush1.bf16.msra.mxu1 %v3100_v31  ;;  %v184_v25 = vld [vmem:[%s3688_s4 + $0x88] sm:$0xff]  ;;  %2229 = vmatmul.mubr.msk.f32.gmra.mrb[2].mxu0 %vm63_vm1, %v46_v24  ;;  %v197_v59 = vld [vmem:[%s3688_s4 + $0xf0] sm:$0xff]  ;;  %v214_v2 = vld [vmem:[#allocation5] sm:$0x3] }
  0x12   :  { %2371 = vmatprep.subr.bf16.mxu1 %v3014_v3  ;;  %397 = vmatprep.mubr.f32.mxu0 %v2945_v7  ;;  %v3224_v30 = vpack.c.bf16 %v186_v26, %v184_v25  ;;  %v188_v36 = vld [vmem:[%s3688_s4 + $0xa8] sm:$0xff] }
  0x13   :  { %2345 = vmatpush1.bf16.msra.mxu0 %v3180_v11 }
  0x14   :  { %2230 = vmatmul.mubr.msk.f32.vlgmr.msra.gmra.mrb[0].mxu1 %vm217_vm2, %v211_v32  ;;  %2347 = vmatprep.subr.bf16.mxu0 %v3183_v12  ;;  %v183_v32 = vld [vmem:[%s3688_s4 + $0x80] sm:$0xff] }
  0x15   :  { %2373 = vmatpush1.bf16.msra.mxu1 %v3035_v9  ;;  %507 = vmatprep.mubr.f32.mxu1 %v2945_v7 }
  0x16   :  { %2375 = vmatprep.subr.bf16.mxu1 %v3054_v16 }
  0x17   :  { %2349 = vmatpush1.bf16.msra.mxu0 %v3198_v18 }
  0x18   :  { %2351 = vmatprep.subr.bf16.mxu0 %v3201_v19 }
  0x19   :  { %2377 = vmatpush1.bf16.msra.mxu1 %v3068_v21 }
  0x1a   :  { %2379 = vmatprep.subr.bf16.mxu1 %v3070_v22 }
  0x1b   :  { %2353 = vmatpush1.bf16.msra.mxu0 %v3221_v29 }
  0x1c   :  { %2355 = vmatprep.subr.bf16.mxu0 %v3224_v30 }
  0x1d   :  { %2381 = vmatpush1.bf16.msra.mxu1 %v3087_v27 }
  0x1e   :  { %2383 = vmatprep.subr.bf16.mxu1 %v3090_v28 }
  0x21   :  { %2385 = vmatpush1.bf16.msra.mxu1 %v3100_v31 }
  0x22   :  { %2387 = vmatprep.subr.bf16.mxu1 %v3147_v61 }
  0xdc   :  { %v136_v40 = vpop.f32.mrb[0].mxu0 }
  0xdd   :  { %v137_v41 = vadd.f32 %v136_v40, %v3123_v38  ;;  %v138_v42 = vpop.f32.mrb[1].mxu0  ;;  %v190_v40 = vld [vmem:[%s3688_s4 + $0xb8] sm:$0xff] }
  0xde   :  { %v139_v43 = vadd.f32 %v138_v42, %v3127_v39  ;;  %v3242_v42 = vpack.c.bf16 %v190_v40, %v188_v36 }
  0xdf   :  { %147 = vst [vmem:[#allocation6] sm:$0xff] %v137_v41  ;;  %v3239_v41 = vpack.c.bf16 %v185_v33, %v183_v32 }
  0xe0   :  { %148 = vst [vmem:[#allocation6 + $0x8] sm:$0xff] %v139_v43  ;;  %v187_v43 = vld [vmem:[%s3688_s4 + $0xa0] sm:$0xff] }
  0xe1   :  { %2357 = vmatpush1.bf16.msra.mxu0 %v3239_v41 }
  0xe2   :  { %2359 = vmatprep.subr.bf16.mxu0 %v3242_v42 }
  0xe6   :  { %v215_v50 = vld [vmem:[#allocation6] sm:$0x3] }
  0xe7   :  { %v287_v44 = vpop.f32.mrb[0].mxu1  ;;  %v216_v45 = vld [vmem:[#allocation6 + $0x8] sm:$0x3] }
  0xe8   :  { %v289_v46 = vpop.f32.mrb[1].mxu1  ;;  %v292_v51 = vadd.f32 %v287_v44, %v215_v50  ;;  %v189_v44 = vld [vmem:[%s3688_s4 + $0xb0] sm:$0xff]  ;;  %v191_v50 = vld [vmem:[%s3688_s4 + $0xc0] sm:$0xff] }
  0xe9   :  { %v3131_v47 = vadd.f32 %v289_v46, %v216_v45  ;;  %v192_v45 = vld [vmem:[%s3688_s4 + $0xc8] sm:$0xff]  ;;  %v194_v46 = vld [vmem:[%s3688_s4 + $0xd8] sm:$0xff] }
  0xea   :  { %v2231_v52 = vmul.f32 -1.442695, %v292_v51  ;;  %v193_v51 = vld [vmem:[%s3688_s4 + $0xd0] sm:$0xff] }
  0xeb   :  { %2729 = vtanh.f32 %v3131_v47  ;;  %v2232_v5 = vmul.f32 -1.442695, %v3131_v47 }
  0xec   :  { %2731 = vpow2.f32 %v2231_v52  ;;  %v196_v52 = vld [vmem:[%s3688_s4 + $0xe8] sm:$0xff] }
  0xf5   :  { %v2730_v48 = vpop.eup %2729 }
  0xf6   :  { %313 = vrot.lane.b32.xlu0 %v2730_v48, %s2946_s3  ;;  %v2732_v53 = vpop.eup %2731  ;;  %v3257_v48 = vpack.c.bf16 %v189_v44, %v187_v43  ;;  %v439_v43 = vld [vmem:[#allocation6 + $0x8] sm:$0xc] }
  0xf7   :  { %v300_v54 = vadd.f32 1.0, %v2732_v53  ;;  %v198_v53 = vld [vmem:[%s3688_s4 + $0xf8] sm:$0xff] }
  0xf8   :  { %2361 = vmatpush1.bf16.msra.mxu0 %v3257_v48 }
  0xf9   :  { %2733 = vrcp.f32 %v300_v54  ;;  %v3275_v54 = vpack.c.bf16 %v193_v51, %v191_v50 }
  0xfa   :  { %308 = vrot.lane.b32.xlu0 %v212_v49, %s2946_s3  ;;  %v3260_v49 = vpack.c.bf16 %v194_v46, %v192_v45 }
  0xfc   :  { %2363 = vmatprep.subr.bf16.mxu0 %v3260_v49 }
  0xfd   :  { %2365 = vmatpush1.bf16.msra.mxu0 %v3275_v54 }
  0xfe   :  { %329 = vrot.lane.b32.xlu0 %v213_v58, %s2946_s3  ;;  %v195_v58 = vld [vmem:[%s3688_s4 + $0xe0] sm:$0xff] }
  0xff   :  { %v3289_v62 = vpack.c.bf16 %v197_v59, %v195_v58 }
 0x102   :  { %418 = vrot.lane.b32.xlu0 %v214_v2, %s2946_s3 }
 0x103   :  { %v3136_v55 = vpop.eup %2733 }
 0x168   :  { %v314_v56 = vpop.permute.xlu0 %313 }
 0x169   :  { %v316_v57 = vmul.f32 %v3136_v55, %v314_v56  ;;  %v3278_v56 = vpack.c.bf16 %v198_v53, %v196_v52  ;;  %v438_v52 = vld [vmem:[#allocation6] sm:$0xc] }
 0x16b   :  { %318 = vrot.lane.b32.xlu1 %v316_v57, %s2946_s3  ;;  %2367 = vmatprep.subr.bf16.mxu0 %v3278_v56 }
 0x16c   :  { %v309_v57 = vpop.permute.xlu0 %308  ;;  %2369 = vmatpush1.bf16.msra.mxu0 %v3289_v62 }
 0x16d   :  { %v311_v60 = vmul.f32 %v3136_v55, %v309_v57  ;;  %2419 = vmatprep.subr.bf16.mxu0 %v3014_v3  ;;  %v142_v55 = vpop.f32.mrb[2].mxu0 }
 0x16e   :  { %v143_v8 = vadd.f32 %v142_v55, %v3123_v38  ;;  %v144_v10 = vpop.f32.mrb[3].mxu0  ;;  %v199_v38 = vld [vmem:[%s3689_s5] sm:$0x3] }
 0x16f   :  { %v145_v13 = vadd.f32 %v144_v10, %v3127_v39  ;;  %v3334_v39 = vrot.slane %v199_v38, %v59_v37  ;;  %v3341_v37 = vrot.slane %v199_v38, %v55_v35 }
 0x170   :  { %149 = vst [vmem:[#allocation6 + $0x10] sm:$0xff] %v143_v8  ;;  %v330_v23 = vpop.permute.xlu0 %329 }
 0x171   :  { %150 = vst [vmem:[#allocation6 + $0x18] sm:$0xff] %v145_v13 }
 0x1dd   :  { %v319_v63 = vpop.permute.xlu1 %318 }
 0x1de   :  { %v3291_v0 = vadd.f32 %v319_v63, %v311_v60 }
 0x1e0   :  { %2735 = vtanh.f32 %v3291_v0 }
 0x1e1   :  { %2737 = vpow2.f32 %v2232_v5  ;;  %v419_v5 = vpop.permute.xlu0 %418 }
 0x1ea   :  { %v2736_v4 = vpop.eup %2735 }
 0x1eb   :  { %324 = vrot.lane.b32.xlu1 %v2736_v4, %s2946_s3  ;;  %v2738_v14 = vpop.eup %2737 }
 0x1ec   :  { %v301_v15 = vadd.f32 1.0, %v2738_v14 }
 0x1ee   :  { %2739 = vrcp.f32 %v301_v15  ;;  %v536_v15 = vrot.slane %v3291_v0, 6 }
 0x1f8   :  { %v2740_v17 = vpop.eup %2739 }
 0x25d   :  { %v325_v20 = vpop.permute.xlu1 %324 }
 0x25e   :  { %v327_v24 = vmul.f32 %v2740_v17, %v325_v20 }
 0x260   :  { %v332_v25 = vsel %vm217_vm2, %v327_v24, %v330_v23  ;;  %2235 = vmatmul.mubr.msk.f32.vlgmr.msra.gmra.mrb[2].mxu1 %vm217_vm2, %v327_v24 }
 0x261   :  { %398 = vmatmul.mubr.f32.vlgmr.msra.gmra.mrb[4].mxu0 %v332_v25  ;;  %2389 = vmatpush1.bf16.msra.mxu1 %v3158_v1 }
 0x262   :  { %2421 = vmatpush1.bf16.msra.mxu0 %v3035_v9  ;;  %735 = vmatprep.mubr.f32.mxu0 %v2945_v7 }
 0x263   :  { %2423 = vmatprep.subr.bf16.mxu0 %v3054_v16  ;;  %2391 = vmatprep.subr.bf16.mxu1 %v3170_v6 }
 0x264   :  { %628 = vmatprep.mubr.f32.mxu1 %v2945_v7 }
 0x265   :  { %2393 = vmatpush1.bf16.msra.mxu1 %v3180_v11 }
 0x266   :  { %2425 = vmatpush1.bf16.msra.mxu0 %v3068_v21  ;;  %2395 = vmatprep.subr.bf16.mxu1 %v3183_v12 }
 0x267   :  { %2427 = vmatprep.subr.bf16.mxu0 %v3070_v22 }
 0x269   :  { %2397 = vmatpush1.bf16.msra.mxu1 %v3198_v18 }
 0x26a   :  { %2429 = vmatpush1.bf16.msra.mxu0 %v3087_v27  ;;  %2399 = vmatprep.subr.bf16.mxu1 %v3201_v19 }
 0x26b   :  { %2431 = vmatprep.subr.bf16.mxu0 %v3090_v28 }
 0x26d   :  { %2401 = vmatpush1.bf16.msra.mxu1 %v3221_v29 }
 0x26e   :  { %2433 = vmatpush1.bf16.msra.mxu0 %v3100_v31  ;;  %2403 = vmatprep.subr.bf16.mxu1 %v3224_v30 }
 0x26f   :  { %2435 = vmatprep.subr.bf16.mxu0 %v3147_v61 }
 0x271   :  { %2405 = vmatpush1.bf16.msra.mxu1 %v3239_v41 }
 0x272   :  { %2407 = vmatprep.subr.bf16.mxu1 %v3242_v42 }
 0x275   :  { %2409 = vmatpush1.bf16.msra.mxu1 %v3257_v48 }
 0x276   :  { %2411 = vmatprep.subr.bf16.mxu1 %v3260_v49 }
 0x279   :  { %2413 = vmatpush1.bf16.msra.mxu1 %v3275_v54 }
 0x27a   :  { %2415 = vmatprep.subr.bf16.mxu1 %v3278_v56 }
 0x27d   :  { %2417 = vmatpush1.bf16.msra.mxu1 %v3289_v62 }
 0x27e   :  { %2467 = vmatprep.subr.bf16.mxu1 %v3014_v3 }
 0x333   :  { %v509_v47 = vpop.f32.mrb[2].mxu1 }
 0x334   :  { %v399_v26 = vpop.f32.mrb[4].mxu0  ;;  %v511_v32 = vpop.f32.mrb[3].mxu1  ;;  %v516_v50 = vrot.slane %v509_v47, 6 }
 0x335   :  { %v517_v33 = vrot.slane %v511_v32, 6  ;;  %v401_v36 = vpop.f32.mrb[5].mxu0  ;;  %v400_v51 = vadd.f32 %v399_v26, %v3341_v37 }
 0x336   :  { %v402_v40 = vadd.f32 %v401_v36, %v3334_v39  ;;  %v520_v53 = vadd.f32 %v516_v50, %v438_v52 }
 0x337   :  { %v521_v44 = vadd.f32 %v517_v33, %v439_v43  ;;  %v2233_v57 = vmul.f32 -1.442695, %v400_v51 }
 0x338   :  { %2741 = vtanh.f32 %v402_v40  ;;  %v2236_v58 = vmul.f32 -1.442695, %v520_v53  ;;  %v2234_v47 = vmul.f32 -1.442695, %v402_v40 }
 0x339   :  { %2743 = vtanh.f32 %v521_v44  ;;  %v2237_v26 = vmul.f32 -1.442695, %v521_v44 }
 0x33a   :  { %2745 = vpow2.f32 %v2233_v57 }
 0x33b   :  { %2747 = vpow2.f32 %v2236_v58 }
 0x342   :  { %v2742_v45 = vpop.eup %2741 }
 0x343   :  { %423 = vrot.lane.b32.xlu1 %v2742_v45, %s2946_s3  ;;  %v2744_v46 = vpop.eup %2743 }
 0x344   :  { %540 = vrot.lane.b32.xlu0 %v2744_v46, %s2946_s3  ;;  %v2746_v59 = vpop.eup %2745 }
 0x345   :  { %v410_v60 = vadd.f32 1.0, %v2746_v59  ;;  %v2748_v63 = vpop.eup %2747 }
 0x346   :  { %v528_v2 = vadd.f32 1.0, %v2748_v63 }
 0x347   :  { %2749 = vrcp.f32 %v410_v60 }
 0x348   :  { %2751 = vrcp.f32 %v528_v2 }
 0x351   :  { %v2750_v4 = vpop.eup %2749 }
 0x352   :  { %v2752_v55 = vpop.eup %2751  ;;  %v421_v13 = vmul.f32 %v2750_v4, %v419_v5 }
 0x353   :  { %v538_v20 = vmul.f32 %v2752_v55, %v536_v15 }
 0x3b5   :  { %v424_v34 = vpop.permute.xlu1 %423 }
 0x3b6   :  { %v426_v35 = vmul.f32 %v2750_v4, %v424_v34  ;;  %v541_v8 = vpop.permute.xlu0 %540  ;;  %v666_v34 = vld [vmem:[#allocation6 + $0x8] sm:$0x30] }
 0x3b7   :  { %v543_v10 = vmul.f32 %v2752_v55, %v541_v8 }
 0x3b8   :  { %428 = vrot.lane.b32.xlu1 %v426_v35, %s2946_s3 }
 0x3bc   :  { %545 = vrot.lane.b32.xlu1 %v543_v10, %s2946_s3 }
 0x42a   :  { %v429_v14 = vpop.permute.xlu1 %428 }
 0x42b   :  { %v3347_v17 = vadd.f32 %v429_v14, %v421_v13  ;;  %v665_v14 = vld [vmem:[#allocation6] sm:$0x30] }
 0x42d   :  { %2753 = vtanh.f32 %v3347_v17 }
 0x42e   :  { %v546_v23 = vpop.permute.xlu1 %545 }
 0x42f   :  { %v3350_v24 = vadd.f32 %v546_v23, %v538_v20 }
 0x431   :  { %2755 = vtanh.f32 %v3350_v24 }
 0x432   :  { %2757 = vpow2.f32 %v2234_v47 }
 0x433   :  { %2759 = vpow2.f32 %v2237_v26 }
 0x437   :  { %v2754_v25 = vpop.eup %2753 }
 0x438   :  { %434 = vrot.lane.b32.xlu0 %v2754_v25, %s2946_s3 }
 0x43b   :  { %v2756_v38 = vpop.eup %2755 }
 0x43c   :  { %551 = vrot.lane.b32.xlu1 %v2756_v38, %s2946_s3  ;;  %v2758_v0 = vpop.eup %2757 }
 0x43d   :  { %v411_v32 = vadd.f32 1.0, %v2758_v0  ;;  %v2760_v33 = vpop.eup %2759 }
 0x43e   :  { %v529_v36 = vadd.f32 1.0, %v2760_v33 }
 0x43f   :  { %2761 = vrcp.f32 %v411_v32 }
 0x440   :  { %2763 = vrcp.f32 %v529_v36 }
 0x449   :  { %v2762_v43 = vpop.eup %2761 }
 0x44a   :  { %v2764_v51 = vpop.eup %2763 }
 0x4aa   :  { %v435_v45 = vpop.permute.xlu0 %434 }
 0x4ab   :  { %v437_v46 = vmul.f32 %v2762_v43, %v435_v45 }
 0x4ad   :  { %v556_v50 = vrot.slane %v437_v46, 6 }
 0x4ae   :  { %v552_v52 = vpop.permute.xlu1 %551 }
 0x4af   :  { %v554_v53 = vmul.f32 %v2764_v51, %v552_v52  ;;  %557 = vrot.lane.b32.xlu0 %v556_v50, %s2946_s3  ;;  %v764_v51 = vrot.slane %v3350_v24, 6 }
 0x4b1   :  { %v668_v57 = vrot.slane %v554_v53, 2 }
 0x4b3   :  { %2240 = vmatmul.mubr.msk.f32.vlgmr.msra.gmra.mrb[6].mxu0 %vm217_vm2, %v668_v57 }
 0x4b4   :  { %2437 = vmatpush1.bf16.msra.mxu0 %v3158_v1  ;;  %856 = vmatprep.mubr.f32.mxu0 %v2945_v7 }
 0x4b5   :  { %2439 = vmatprep.subr.bf16.mxu0 %v3170_v6 }
 0x4b8   :  { %2441 = vmatpush1.bf16.msra.mxu0 %v3180_v11 }
 0x4b9   :  { %2443 = vmatprep.subr.bf16.mxu0 %v3183_v12 }
 0x4bc   :  { %2445 = vmatpush1.bf16.msra.mxu0 %v3198_v18 }
 0x4bd   :  { %2447 = vmatprep.subr.bf16.mxu0 %v3201_v19 }
 0x4c0   :  { %2449 = vmatpush1.bf16.msra.mxu0 %v3221_v29 }
 0x4c1   :  { %2451 = vmatprep.subr.bf16.mxu0 %v3224_v30 }
 0x4c4   :  { %2453 = vmatpush1.bf16.msra.mxu0 %v3239_v41 }
 0x4c5   :  { %2455 = vmatprep.subr.bf16.mxu0 %v3242_v42 }
 0x4c8   :  { %2457 = vmatpush1.bf16.msra.mxu0 %v3257_v48 }
 0x4c9   :  { %2459 = vmatprep.subr.bf16.mxu0 %v3260_v49 }
 0x4cc   :  { %2461 = vmatpush1.bf16.msra.mxu0 %v3275_v54 }
 0x4cd   :  { %2463 = vmatprep.subr.bf16.mxu0 %v3278_v56 }
 0x4d0   :  { %2465 = vmatpush1.bf16.msra.mxu0 %v3289_v62 }
 0x4d1   :  { %2515 = vmatprep.subr.bf16.mxu0 %v3014_v3 }
 0x521   :  { %v558_v40 = vpop.permute.xlu0 %557 }
 0x522   :  { %v560_v44 = vsel %vm217_vm2, %v554_v53, %v558_v40 }
 0x523   :  { %v562_v58 = vrot.slane %v560_v44, 2 }
 0x525   :  { %629 = vmatmul.mubr.f32.vlgmr.msra.gmra.mrb[4].mxu1 %v562_v58 }
 0x526   :  { %2469 = vmatpush1.bf16.msra.mxu1 %v3035_v9  ;;  %963 = vmatprep.mubr.f32.mxu1 %v2945_v7 }
 0x527   :  { %2471 = vmatprep.subr.bf16.mxu1 %v3054_v16 }
 0x52a   :  { %2473 = vmatpush1.bf16.msra.mxu1 %v3068_v21 }
 0x52b   :  { %2475 = vmatprep.subr.bf16.mxu1 %v3070_v22 }
 0x52e   :  { %2477 = vmatpush1.bf16.msra.mxu1 %v3087_v27 }
 0x52f   :  { %2479 = vmatprep.subr.bf16.mxu1 %v3090_v28 }
 0x532   :  { %2481 = vmatpush1.bf16.msra.mxu1 %v3100_v31 }
 0x533   :  { %2483 = vmatprep.subr.bf16.mxu1 %v3147_v61 }
 0x586   :  { %v737_v59 = vpop.f32.mrb[6].mxu0 }
 0x587   :  { %v739_v60 = vpop.f32.mrb[7].mxu0  ;;  %v744_v10 = vrot.slane %v737_v59, 4 }
 0x588   :  { %v745_v63 = vrot.slane %v739_v60, 4 }
 0x589   :  { %v748_v15 = vadd.f32 %v744_v10, %v665_v14 }
 0x58a   :  { %v749_v35 = vadd.f32 %v745_v63, %v666_v34 }
 0x58b   :  { %v2241_v23 = vmul.f32 -1.442695, %v748_v15 }
 0x58c   :  { %v2242_v59 = vmul.f32 -1.442695, %v749_v35 }
 0x5f8   :  { %v630_v2 = vpop.f32.mrb[4].mxu1 }
 0x5f9   :  { %v632_v4 = vpop.f32.mrb[5].mxu1  ;;  %v631_v13 = vadd.f32 %v630_v2, %v3341_v37 }
 0x5fa   :  { %v633_v5 = vadd.f32 %v632_v4, %v3334_v39 }
 0x5fb   :  { %v2238_v20 = vmul.f32 -1.442695, %v631_v13 }
 0x5fc   :  { %2765 = vtanh.f32 %v633_v5 }
 0x5fd   :  { %2767 = vtanh.f32 %v749_v35 }
 0x5fe   :  { %2769 = vpow2.f32 %v2238_v20 }
 0x5ff   :  { %2771 = vpow2.f32 %v2241_v23 }
 0x606   :  { %v2766_v55 = vpop.eup %2765 }
 0x607   :  { %650 = vrot.lane.b32.xlu1 %v2766_v55, %s2946_s3  ;;  %v2768_v8 = vpop.eup %2767 }
 0x608   :  { %v2770_v25 = vpop.eup %2769 }
 0x609   :  { %v641_v38 = vadd.f32 1.0, %v2770_v25  ;;  %v2772_v47 = vpop.eup %2771 }
 0x60a   :  { %v756_v26 = vadd.f32 1.0, %v2772_v47 }
 0x60b   :  { %768 = vrot.lane.b32.xlu1 %v2768_v8, %s2946_s3  ;;  %2773 = vrcp.f32 %v641_v38 }
 0x60c   :  { %2775 = vrcp.f32 %v756_v26 }
 0x615   :  { %v2774_v0 = vpop.eup %2773 }
 0x616   :  { %v2776_v36 = vpop.eup %2775  ;;  %v648_v46 = vmul.f32 %v2774_v0, %v3347_v17  ;;  %v2239_v17 = vmul.f32 -1.442695, %v633_v5 }
 0x617   :  { %v766_v53 = vmul.f32 %v2776_v36, %v764_v51 }
 0x679   :  { %v651_v32 = vpop.permute.xlu1 %650 }
 0x67a   :  { %v653_v33 = vmul.f32 %v2774_v0, %v651_v32  ;;  %v894_v32 = vld [vmem:[#allocation6 + $0x8] sm:$0xc0] }
 0x67c   :  { %655 = vrot.lane.b32.xlu0 %v653_v33, %s2946_s3 }
 0x67d   :  { %v769_v43 = vpop.permute.xlu1 %768 }
 0x67e   :  { %v771_v45 = vmul.f32 %v2776_v36, %v769_v43 }
 0x680   :  { %773 = vrot.lane.b32.xlu0 %v771_v45, %s2946_s3 }
 0x6ee   :  { %v656_v50 = vpop.permute.xlu0 %655 }
 0x6ef   :  { %v3392_v52 = vadd.f32 %v656_v50, %v648_v46  ;;  %v893_v50 = vld [vmem:[#allocation6] sm:$0xc0] }
 0x6f1   :  { %2777 = vtanh.f32 %v3392_v52 }
 0x6f2   :  { %v774_v57 = vpop.permute.xlu0 %773 }
 0x6f3   :  { %v3395_v40 = vadd.f32 %v774_v57, %v766_v53 }
 0x6f5   :  { %2779 = vtanh.f32 %v3395_v40 }
 0x6f6   :  { %2781 = vpow2.f32 %v2239_v17 }
 0x6f7   :  { %2783 = vpow2.f32 %v2242_v59 }
 0x6fb   :  { %v2778_v44 = vpop.eup %2777 }
 0x6fc   :  { %661 = vrot.lane.b32.xlu1 %v2778_v44, %s2946_s3 }
 0x6ff   :  { %v2780_v58 = vpop.eup %2779 }
 0x700   :  { %779 = vrot.lane.b32.xlu0 %v2780_v58, %s2946_s3  ;;  %v2782_v24 = vpop.eup %2781 }
 0x701   :  { %v642_v60 = vadd.f32 1.0, %v2782_v24  ;;  %v2784_v63 = vpop.eup %2783 }
 0x702   :  { %v757_v2 = vadd.f32 1.0, %v2784_v63 }
 0x703   :  { %2785 = vrcp.f32 %v642_v60 }
 0x704   :  { %2787 = vrcp.f32 %v757_v2 }
 0x70d   :  { %v2786_v4 = vpop.eup %2785 }
 0x70e   :  { %v2788_v10 = vpop.eup %2787 }
 0x76e   :  { %v662_v34 = vpop.permute.xlu1 %661 }
 0x76f   :  { %v664_v55 = vmul.f32 %v2786_v4, %v662_v34 }
 0x771   :  { %v784_v8 = vrot.slane %v664_v55, 4 }
 0x772   :  { %v780_v13 = vpop.permute.xlu0 %779 }
 0x773   :  { %v782_v14 = vmul.f32 %v2788_v10, %v780_v13  ;;  %785 = vrot.lane.b32.xlu1 %v784_v8, %s2946_s3  ;;  %v992_v10 = vrot.slane %v3395_v40, 6 }
 0x775   :  { %v896_v15 = vrot.slane %v782_v14, 4 }
 0x777   :  { %2245 = vmatmul.mubr.msk.f32.vlgmr.msra.gmra.mrb[6].mxu1 %vm217_vm2, %v896_v15 }
 0x778   :  { %2485 = vmatpush1.bf16.msra.mxu1 %v3158_v1  ;;  %1084 = vmatprep.mubr.f32.mxu1 %v2945_v7 }
 0x779   :  { %2487 = vmatprep.subr.bf16.mxu1 %v3170_v6 }
 0x77c   :  { %2489 = vmatpush1.bf16.msra.mxu1 %v3180_v11 }
 0x77d   :  { %2491 = vmatprep.subr.bf16.mxu1 %v3183_v12 }
 0x780   :  { %2493 = vmatpush1.bf16.msra.mxu1 %v3198_v18 }
 0x781   :  { %2495 = vmatprep.subr.bf16.mxu1 %v3201_v19 }
 0x784   :  { %2497 = vmatpush1.bf16.msra.mxu1 %v3221_v29 }
 0x785   :  { %2499 = vmatprep.subr.bf16.mxu1 %v3224_v30 }
 0x788   :  { %2501 = vmatpush1.bf16.msra.mxu1 %v3239_v41 }
 0x789   :  { %2503 = vmatprep.subr.bf16.mxu1 %v3242_v42 }
 0x78c   :  { %2505 = vmatpush1.bf16.msra.mxu1 %v3257_v48 }
 0x78d   :  { %2507 = vmatprep.subr.bf16.mxu1 %v3260_v49 }
 0x790   :  { %2509 = vmatpush1.bf16.msra.mxu1 %v3275_v54 }
 0x791   :  { %2511 = vmatprep.subr.bf16.mxu1 %v3278_v56 }
 0x794   :  { %2513 = vmatpush1.bf16.msra.mxu1 %v3289_v62 }
 0x795   :  { %2563 = vmatprep.subr.bf16.mxu1 %v3014_v3 }
 0x7e5   :  { %v786_v5 = vpop.permute.xlu1 %785 }
 0x7e6   :  { %v788_v35 = vsel %vm217_vm2, %v782_v14, %v786_v5 }
 0x7e7   :  { %v790_v20 = vrot.slane %v788_v35, 4 }
 0x7e9   :  { %857 = vmatmul.mubr.f32.vlgmr.msra.gmra.mrb[8].mxu0 %v790_v20 }
 0x7ea   :  { %2517 = vmatpush1.bf16.msra.mxu0 %v3035_v9  ;;  %1191 = vmatprep.mubr.f32.mxu0 %v2945_v7 }
 0x7eb   :  { %2519 = vmatprep.subr.bf16.mxu0 %v3054_v16 }
 0x7ee   :  { %2521 = vmatpush1.bf16.msra.mxu0 %v3068_v21 }
 0x7ef   :  { %2523 = vmatprep.subr.bf16.mxu0 %v3070_v22 }
 0x7f2   :  { %2525 = vmatpush1.bf16.msra.mxu0 %v3087_v27 }
 0x7f3   :  { %2527 = vmatprep.subr.bf16.mxu0 %v3090_v28 }
 0x7f6   :  { %2529 = vmatpush1.bf16.msra.mxu0 %v3100_v31 }
 0x7f7   :  { %2531 = vmatprep.subr.bf16.mxu0 %v3147_v61 }
 0x84a   :  { %v965_v23 = vpop.f32.mrb[6].mxu1 }
 0x84b   :  { %v967_v25 = vpop.f32.mrb[7].mxu1  ;;  %v972_v45 = vrot.slane %v965_v23, 2 }
 0x84c   :  { %v973_v38 = vrot.slane %v967_v25, 2 }
 0x84d   :  { %v976_v51 = vadd.f32 %v972_v45, %v893_v50 }
 0x84e   :  { %v977_v33 = vadd.f32 %v973_v38, %v894_v32 }
 0x84f   :  { %v2246_v57 = vmul.f32 -1.442695, %v976_v51 }
 0x850   :  { %v2247_v23 = vmul.f32 -1.442695, %v977_v33 }
 0x8bc   :  { %v858_v47 = vpop.f32.mrb[8].mxu0 }
 0x8bd   :  { %v860_v26 = vpop.f32.mrb[9].mxu0  ;;  %v859_v46 = vadd.f32 %v858_v47, %v3341_v37 }
 0x8be   :  { %v861_v0 = vadd.f32 %v860_v26, %v3334_v39 }
 0x8bf   :  { %v2243_v53 = vmul.f32 -1.442695, %v859_v46 }
 0x8c0   :  { %2789 = vtanh.f32 %v861_v0 }
 0x8c1   :  { %2791 = vtanh.f32 %v977_v33 }
 0x8c2   :  { %2793 = vpow2.f32 %v2243_v53 }
 0x8c3   :  { %2795 = vpow2.f32 %v2246_v57 }
 0x8ca   :  { %v2790_v36 = vpop.eup %2789 }
 0x8cb   :  { %878 = vrot.lane.b32.xlu0 %v2790_v36, %s2946_s3  ;;  %v2792_v43 = vpop.eup %2791 }
 0x8cc   :  { %v2794_v44 = vpop.eup %2793 }
 0x8cd   :  { %v869_v58 = vadd.f32 1.0, %v2794_v44  ;;  %v2796_v17 = vpop.eup %2795  ;;  %v1122_v44 = vld [vmem:[#allocation6 + $0x18] sm:$0x3] }
 0x8ce   :  { %v984_v59 = vadd.f32 1.0, %v2796_v17 }
 0x8cf   :  { %996 = vrot.lane.b32.xlu0 %v2792_v43, %s2946_s3  ;;  %2797 = vrcp.f32 %v869_v58 }
 0x8d0   :  { %2799 = vrcp.f32 %v984_v59 }
 0x8d9   :  { %v2798_v24 = vpop.eup %2797 }
 0x8da   :  { %v2800_v2 = vpop.eup %2799  ;;  %v876_v55 = vmul.f32 %v2798_v24, %v3392_v52  ;;  %v2244_v52 = vmul.f32 -1.442695, %v861_v0 }
 0x8db   :  { %v994_v14 = vmul.f32 %v2800_v2, %v992_v10 }
 0x93d   :  { %v879_v60 = vpop.permute.xlu0 %878 }
 0x93e   :  { %v881_v63 = vmul.f32 %v2798_v24, %v879_v60  ;;  %v1121_v24 = vld [vmem:[#allocation6 + $0x10] sm:$0x3] }
 0x940   :  { %883 = vrot.lane.b32.xlu1 %v881_v63, %s2946_s3 }
 0x941   :  { %v997_v4 = vpop.permute.xlu0 %996 }
 0x942   :  { %v999_v34 = vmul.f32 %v2800_v2, %v997_v4 }
 0x944   :  { %1001 = vrot.lane.b32.xlu1 %v999_v34, %s2946_s3 }
 0x9b2   :  { %v884_v8 = vpop.permute.xlu1 %883 }
 0x9b3   :  { %v3437_v13 = vadd.f32 %v884_v8, %v876_v55 }
 0x9b5   :  { %2801 = vtanh.f32 %v3437_v13 }
 0x9b6   :  { %v1002_v15 = vpop.permute.xlu1 %1001 }
 0x9b7   :  { %v3440_v5 = vadd.f32 %v1002_v15, %v994_v14 }
 0x9b9   :  { %2803 = vtanh.f32 %v3440_v5 }
 0x9ba   :  { %2805 = vpow2.f32 %v2244_v52 }
 0x9bb   :  { %2807 = vpow2.f32 %v2247_v23 }
 0x9bf   :  { %v2802_v35 = vpop.eup %2801 }
 0x9c0   :  { %889 = vrot.lane.b32.xlu0 %v2802_v35, %s2946_s3 }
 0x9c3   :  { %v2804_v20 = vpop.eup %2803 }
 0x9c4   :  { %1007 = vrot.lane.b32.xlu1 %v2804_v20, %s2946_s3  ;;  %v2806_v40 = vpop.eup %2805 }
 0x9c5   :  { %v870_v25 = vadd.f32 1.0, %v2806_v40  ;;  %v2808_v38 = vpop.eup %2807 }
 0x9c6   :  { %v985_v47 = vadd.f32 1.0, %v2808_v38  ;;  %v1214_v38 = vrot.slane %v3440_v5, 6 }
 0x9c7   :  { %2809 = vrcp.f32 %v870_v25 }
 0x9c8   :  { %2811 = vrcp.f32 %v985_v47 }
 0x9d1   :  { %v2810_v26 = vpop.eup %2809 }
 0x9d2   :  { %v2812_v45 = vpop.eup %2811 }
 0xa32   :  { %v890_v32 = vpop.permute.xlu0 %889 }
 0xa33   :  { %v892_v36 = vmul.f32 %v2810_v26, %v890_v32 }
 0xa35   :  { %v1012_v43 = vrot.slane %v892_v36, 2 }
 0xa36   :  { %v1008_v46 = vpop.permute.xlu1 %1007 }
 0xa37   :  { %v1010_v50 = vmul.f32 %v2812_v45, %v1008_v46  ;;  %1013 = vrot.lane.b32.xlu0 %v1012_v43, %s2946_s3 }
 0xa39   :  { %v1124_v51 = vrot.slane %v1010_v50, 6 }
 0xa3b   :  { %2250 = vmatmul.mubr.msk.f32.vlgmr.msra.gmra.mrb[10].mxu0 %vm217_vm2, %v1124_v51 }
 0xa3c   :  { %2533 = vmatpush1.bf16.msra.mxu0 %v3158_v1  ;;  %1302 = vmatprep.mubr.f32.mxu0 %v2945_v7 }
 0xa3d   :  { %2535 = vmatprep.subr.bf16.mxu0 %v3170_v6 }
 0xa40   :  { %2537 = vmatpush1.bf16.msra.mxu0 %v3180_v11 }
 0xa41   :  { %2539 = vmatprep.subr.bf16.mxu0 %v3183_v12 }
 0xa44   :  { %2541 = vmatpush1.bf16.msra.mxu0 %v3198_v18 }
 0xa45   :  { %2543 = vmatprep.subr.bf16.mxu0 %v3201_v19 }
 0xa48   :  { %2545 = vmatpush1.bf16.msra.mxu0 %v3221_v29 }
 0xa49   :  { %2547 = vmatprep.subr.bf16.mxu0 %v3224_v30 }
 0xa4c   :  { %2549 = vmatpush1.bf16.msra.mxu0 %v3239_v41 }
 0xa4d   :  { %2551 = vmatprep.subr.bf16.mxu0 %v3242_v42 }
 0xa50   :  { %2553 = vmatpush1.bf16.msra.mxu0 %v3257_v48 }
 0xa51   :  { %2555 = vmatprep.subr.bf16.mxu0 %v3260_v49 }
 0xa54   :  { %2557 = vmatpush1.bf16.msra.mxu0 %v3275_v54 }
 0xa55   :  { %2559 = vmatprep.subr.bf16.mxu0 %v3278_v56 }
 0xa58   :  { %2561 = vmatpush1.bf16.msra.mxu0 %v3289_v62 }
 0xa59   :  { %2611 = vmatprep.subr.bf16.mxu0 %v3014_v3 }
 0xaa9   :  { %v1014_v0 = vpop.permute.xlu0 %1013 }
 0xaaa   :  { %v1016_v33 = vsel %vm217_vm2, %v1010_v50, %v1014_v0 }
 0xaab   :  { %v1018_v53 = vrot.slane %v1016_v33, 6 }
 0xaad   :  { %1085 = vmatmul.mubr.f32.vlgmr.msra.gmra.mrb[8].mxu1 %v1018_v53 }
 0xaae   :  { %2565 = vmatpush1.bf16.msra.mxu1 %v3035_v9  ;;  %1408 = vmatprep.mubr.f32.mxu1 %v2945_v7 }
 0xaaf   :  { %2567 = vmatprep.subr.bf16.mxu1 %v3054_v16 }
 0xab2   :  { %2569 = vmatpush1.bf16.msra.mxu1 %v3068_v21 }
 0xab3   :  { %2571 = vmatprep.subr.bf16.mxu1 %v3070_v22 }
 0xab6   :  { %2573 = vmatpush1.bf16.msra.mxu1 %v3087_v27 }
 0xab7   :  { %2575 = vmatprep.subr.bf16.mxu1 %v3090_v28 }
 0xaba   :  { %2577 = vmatpush1.bf16.msra.mxu1 %v3100_v31 }
 0xabb   :  { %2579 = vmatprep.subr.bf16.mxu1 %v3147_v61 }
 0xb0e   :  { %v1193_v57 = vpop.f32.mrb[10].mxu0 }
 0xb0f   :  { %v1195_v58 = vpop.f32.mrb[11].mxu0  ;;  %v1198_v60 = vadd.f32 %v1193_v57, %v1121_v24 }
 0xb10   :  { %v1199_v17 = vadd.f32 %v1195_v58, %v1122_v44 }
 0xb11   :  { %v2251_v63 = vmul.f32 -1.442695, %v1198_v60 }
 0xb12   :  { %2813 = vtanh.f32 %v1199_v17  ;;  %v2252_v46 = vmul.f32 -1.442695, %v1199_v17 }
 0xb13   :  { %2815 = vpow2.f32 %v2251_v63 }
 0xb1c   :  { %v2814_v59 = vpop.eup %2813 }
 0xb1d   :  { %1218 = vrot.lane.b32.xlu0 %v2814_v59, %s2946_s3  ;;  %v2816_v2 = vpop.eup %2815 }
 0xb1e   :  { %v1206_v34 = vadd.f32 1.0, %v2816_v2 }
 0xb80   :  { %v1086_v4 = vpop.f32.mrb[8].mxu1 }
 0xb81   :  { %v1088_v55 = vpop.f32.mrb[9].mxu1  ;;  %v1087_v20 = vadd.f32 %v1086_v4, %v3341_v37 }
 0xb82   :  { %v1089_v8 = vadd.f32 %v1088_v55, %v3334_v39 }
 0xb83   :  { %v2248_v52 = vmul.f32 -1.442695, %v1087_v20 }
 0xb84   :  { %2817 = vtanh.f32 %v1089_v8 }
 0xb85   :  { %2819 = vrcp.f32 %v1206_v34 }
 0xb86   :  { %2821 = vpow2.f32 %v2248_v52 }
 0xb8e   :  { %v2818_v10 = vpop.eup %2817 }
 0xb8f   :  { %v2820_v14 = vpop.eup %2819  ;;  %1106 = vrot.lane.b32.xlu1 %v2818_v10, %s2946_s3  ;;  %v1219_v15 = vpop.permute.xlu0 %1218 }
 0xb90   :  { %v1221_v35 = vmul.f32 %v2820_v14, %v1219_v15  ;;  %v2822_v23 = vpop.eup %2821  ;;  %v1216_v32 = vmul.f32 %v2820_v14, %v1214_v38  ;;  %v1340_v15 = vld [vmem:[#allocation6 + $0x18] sm:$0xc] }
 0xb91   :  { %v1097_v40 = vadd.f32 1.0, %v2822_v23 }
 0xb92   :  { %1223 = vrot.lane.b32.xlu0 %v1221_v35, %s2946_s3 }
 0xb93   :  { %2823 = vrcp.f32 %v1097_v40 }
 0xb9d   :  { %v2824_v25 = vpop.eup %2823 }
 0xb9e   :  { %v1104_v51 = vmul.f32 %v2824_v25, %v3437_v13  ;;  %v2249_v13 = vmul.f32 -1.442695, %v1089_v8 }
 0xc01   :  { %v1107_v47 = vpop.permute.xlu1 %1106 }
 0xc02   :  { %v1109_v26 = vmul.f32 %v2824_v25, %v1107_v47  ;;  %v1339_v25 = vld [vmem:[#allocation6 + $0x10] sm:$0xc] }
 0xc04   :  { %1111 = vrot.lane.b32.xlu1 %v1109_v26, %s2946_s3  ;;  %v1224_v36 = vpop.permute.xlu0 %1223 }
 0xc05   :  { %v3481_v43 = vadd.f32 %v1224_v36, %v1216_v32 }
 0xc07   :  { %2825 = vtanh.f32 %v3481_v43 }
 0xc08   :  { %2827 = vpow2.f32 %v2252_v46 }
 0xc11   :  { %v2826_v45 = vpop.eup %2825 }
 0xc12   :  { %1229 = vrot.lane.b32.xlu0 %v2826_v45, %s2946_s3  ;;  %v2828_v50 = vpop.eup %2827 }
 0xc13   :  { %v1207_v0 = vadd.f32 1.0, %v2828_v50 }
 0xc76   :  { %v1112_v5 = vpop.permute.xlu1 %1111 }
 0xc77   :  { %v3486_v33 = vadd.f32 %v1112_v5, %v1104_v51 }
 0xc79   :  { %2829 = vtanh.f32 %v3486_v33 }
 0xc7a   :  { %2831 = vrcp.f32 %v1207_v0 }
 0xc7b   :  { %2833 = vpow2.f32 %v2249_v13  ;;  %v1437_v13 = vrot.slane %v3481_v43, 6 }
 0xc83   :  { %v2830_v53 = vpop.eup %2829 }
 0xc84   :  { %v2832_v57 = vpop.eup %2831  ;;  %1117 = vrot.lane.b32.xlu1 %v2830_v53, %s2946_s3  ;;  %v1230_v44 = vpop.permute.xlu0 %1229 }
 0xc85   :  { %v1232_v58 = vmul.f32 %v2832_v57, %v1230_v44  ;;  %v2834_v17 = vpop.eup %2833 }
 0xc86   :  { %v1098_v59 = vadd.f32 1.0, %v2834_v17 }
 0xc87   :  { %2255 = vmatmul.mubr.msk.f32.vlgmr.msra.gmra.mrb[10].mxu1 %vm217_vm2, %v1232_v58 }
 0xc88   :  { %2581 = vmatpush1.bf16.msra.mxu1 %v3158_v1  ;;  %1529 = vmatprep.mubr.f32.mxu1 %v2945_v7  ;;  %2835 = vrcp.f32 %v1098_v59 }
 0xc89   :  { %2583 = vmatprep.subr.bf16.mxu1 %v3170_v6 }
 0xc8c   :  { %2585 = vmatpush1.bf16.msra.mxu1 %v3180_v11 }
 0xc8d   :  { %2587 = vmatprep.subr.bf16.mxu1 %v3183_v12 }
 0xc90   :  { %2589 = vmatpush1.bf16.msra.mxu1 %v3198_v18 }
 0xc91   :  { %2591 = vmatprep.subr.bf16.mxu1 %v3201_v19 }
 0xc92   :  { %v2836_v24 = vpop.eup %2835 }
 0xc94   :  { %2593 = vmatpush1.bf16.msra.mxu1 %v3221_v29 }
 0xc95   :  { %2595 = vmatprep.subr.bf16.mxu1 %v3224_v30 }
 0xc98   :  { %2597 = vmatpush1.bf16.msra.mxu1 %v3239_v41 }
 0xc99   :  { %2599 = vmatprep.subr.bf16.mxu1 %v3242_v42 }
 0xc9c   :  { %2601 = vmatpush1.bf16.msra.mxu1 %v3257_v48 }
 0xc9d   :  { %2603 = vmatprep.subr.bf16.mxu1 %v3260_v49 }
 0xca0   :  { %2605 = vmatpush1.bf16.msra.mxu1 %v3275_v54 }
 0xca1   :  { %2607 = vmatprep.subr.bf16.mxu1 %v3278_v56 }
 0xca4   :  { %2609 = vmatpush1.bf16.msra.mxu1 %v3289_v62 }
 0xca5   :  { %2659 = vmatprep.subr.bf16.mxu1 %v3014_v3 }
 0xcf6   :  { %v1118_v60 = vpop.permute.xlu1 %1117 }
 0xcf7   :  { %v1120_v63 = vmul.f32 %v2836_v24, %v1118_v60 }
 0xcf9   :  { %1234 = vrot.lane.b32.xlu1 %v1120_v63, %s2946_s3 }
 0xd5a   :  { %v1410_v2 = vpop.f32.mrb[10].mxu1 }
 0xd5b   :  { %v1412_v4 = vpop.f32.mrb[11].mxu1  ;;  %v1417_v23 = vrot.slane %v1410_v2, 6 }
 0xd5c   :  { %v1418_v3 = vrot.slane %v1412_v4, 6 }
 0xd5d   :  { %v1421_v38 = vadd.f32 %v1417_v23, %v1339_v25 }
 0xd5e   :  { %v1422_v35 = vadd.f32 %v1418_v3, %v1340_v15 }
 0xd5f   :  { %v2256_v26 = vmul.f32 -1.442695, %v1421_v38 }
 0xd60   :  { %v2257_v4 = vmul.f32 -1.442695, %v1422_v35 }
 0xd6b   :  { %v1235_v34 = vpop.permute.xlu1 %1234 }
 0xd6c   :  { %v1237_v55 = vsel %vm217_vm2, %v1232_v58, %v1235_v34 }
 0xd6d   :  { %1303 = vmatmul.mubr.f32.vlgmr.msra.gmra.mrb[12].mxu0 %v1237_v55 }
 0xd6e   :  { %2613 = vmatpush1.bf16.msra.mxu0 %v3035_v9  ;;  %1636 = vmatprep.mubr.f32.mxu0 %v2945_v7 }
 0xd6f   :  { %2615 = vmatprep.subr.bf16.mxu0 %v3054_v16 }
 0xd72   :  { %2617 = vmatpush1.bf16.msra.mxu0 %v3068_v21 }
 0xd73   :  { %2619 = vmatprep.subr.bf16.mxu0 %v3070_v22 }
 0xd76   :  { %2621 = vmatpush1.bf16.msra.mxu0 %v3087_v27 }
 0xd77   :  { %2623 = vmatprep.subr.bf16.mxu0 %v3090_v28 }
 0xd7a   :  { %2625 = vmatpush1.bf16.msra.mxu0 %v3100_v31 }
 0xd7b   :  { %2627 = vmatprep.subr.bf16.mxu0 %v3147_v61 }
 0xe40   :  { %v1304_v8 = vpop.f32.mrb[12].mxu0 }
 0xe41   :  { %v1306_v10 = vpop.f32.mrb[13].mxu0  ;;  %v1305_v40 = vadd.f32 %v1304_v8, %v3341_v37 }
 0xe42   :  { %v1307_v14 = vadd.f32 %v1306_v10, %v3334_v39 }
 0xe43   :  { %v2253_v47 = vmul.f32 -1.442695, %v1305_v40 }
 0xe44   :  { %2837 = vtanh.f32 %v1307_v14 }
 0xe45   :  { %2839 = vtanh.f32 %v1422_v35 }
 0xe46   :  { %2841 = vpow2.f32 %v2253_v47 }
 0xe47   :  { %2843 = vpow2.f32 %v2256_v26 }
 0xe4e   :  { %v2838_v20 = vpop.eup %2837 }
 0xe4f   :  { %1324 = vrot.lane.b32.xlu0 %v2838_v20, %s2946_s3  ;;  %v2840_v52 = vpop.eup %2839 }
 0xe50   :  { %v2842_v32 = vpop.eup %2841 }
 0xe51   :  { %v1315_v36 = vadd.f32 1.0, %v2842_v32  ;;  %v2844_v45 = vpop.eup %2843 }
 0xe52   :  { %v1429_v46 = vadd.f32 1.0, %v2844_v45 }
 0xe53   :  { %1441 = vrot.lane.b32.xlu0 %v2840_v52, %s2946_s3  ;;  %2845 = vrcp.f32 %v1315_v36 }
 0xe54   :  { %2847 = vrcp.f32 %v1429_v46 }
 0xe5d   :  { %v2846_v50 = vpop.eup %2845 }
 0xe5e   :  { %v2848_v5 = vpop.eup %2847  ;;  %v1322_v44 = vmul.f32 %v2846_v50, %v3486_v33  ;;  %v2254_v33 = vmul.f32 -1.442695, %v1307_v14 }
 0xe5f   :  { %v1439_v59 = vmul.f32 %v2848_v5, %v1437_v13 }
 0xec1   :  { %v1325_v51 = vpop.permute.xlu0 %1324 }
 0xec2   :  { %v1327_v0 = vmul.f32 %v2846_v50, %v1325_v51 }
 0xec4   :  { %1329 = vrot.lane.b32.xlu1 %v1327_v0, %s2946_s3 }
 0xec5   :  { %v1442_v53 = vpop.permute.xlu0 %1441 }
 0xec6   :  { %v1444_v57 = vmul.f32 %v2848_v5, %v1442_v53 }
 0xec8   :  { %1446 = vrot.lane.b32.xlu1 %v1444_v57, %s2946_s3 }
 0xf36   :  { %v1330_v58 = vpop.permute.xlu1 %1329 }
 0xf37   :  { %v3527_v17 = vadd.f32 %v1330_v58, %v1322_v44 }
 0xf39   :  { %2849 = vtanh.f32 %v3527_v17 }
 0xf3a   :  { %v1447_v24 = vpop.permute.xlu1 %1446 }
 0xf3b   :  { %v3530_v60 = vadd.f32 %v1447_v24, %v1439_v59 }
 0xf3d   :  { %2851 = vtanh.f32 %v3530_v60 }
 0xf3e   :  { %2853 = vpow2.f32 %v2254_v33 }
 0xf3f   :  { %2855 = vpow2.f32 %v2257_v4  ;;  %v1665_v4 = vrot.slane %v3530_v60, 6 }
 0xf43   :  { %v2850_v63 = vpop.eup %2849 }
 0xf44   :  { %1335 = vrot.lane.b32.xlu0 %v2850_v63, %s2946_s3 }
 0xf47   :  { %v2852_v2 = vpop.eup %2851 }
 0xf48   :  { %1452 = vrot.lane.b32.xlu1 %v2852_v2, %s2946_s3  ;;  %v2854_v43 = vpop.eup %2853 }
 0xf49   :  { %v1316_v34 = vadd.f32 1.0, %v2854_v43  ;;  %v2856_v55 = vpop.eup %2855 }
 0xf4a   :  { %v1430_v3 = vadd.f32 1.0, %v2856_v55 }
 0xf4b   :  { %2857 = vrcp.f32 %v1316_v34 }
 0xf4c   :  { %2859 = vrcp.f32 %v1430_v3 }
 0xf55   :  { %v2858_v8 = vpop.eup %2857 }
 0xf56   :  { %v2860_v52 = vpop.eup %2859 }
 0xfb6   :  { %v1336_v10 = vpop.permute.xlu0 %1335 }
 0xfb7   :  { %v1338_v15 = vmul.f32 %v2858_v8, %v1336_v10 }
 0xfb9   :  { %v1457_v20 = vrot.slane %v1338_v15, 6 }
 0xfba   :  { %v1453_v23 = vpop.permute.xlu1 %1452 }
 0xfbb   :  { %v1455_v40 = vmul.f32 %v2860_v52, %v1453_v23  ;;  %1458 = vrot.lane.b32.xlu0 %v1457_v20, %s2946_s3 }
 0xfbd   :  { %v1569_v25 = vrot.slane %v1455_v40, 2 }
 0xfbf   :  { %2260 = vmatmul.mubr.msk.f32.vlgmr.msra.gmra.mrb[14].mxu0 %vm217_vm2, %v1569_v25 }
 0xfc0   :  { %2629 = vmatpush1.bf16.msra.mxu0 %v3158_v1  ;;  %1757 = vmatprep.mubr.f32.mxu0 %v2945_v7 }
 0xfc1   :  { %2631 = vmatprep.subr.bf16.mxu0 %v3170_v6 }
 0xfc4   :  { %2633 = vmatpush1.bf16.msra.mxu0 %v3180_v11 }
 0xfc5   :  { %2635 = vmatprep.subr.bf16.mxu0 %v3183_v12 }
 0xfc8   :  { %2637 = vmatpush1.bf16.msra.mxu0 %v3198_v18 }
 0xfc9   :  { %2639 = vmatprep.subr.bf16.mxu0 %v3201_v19 }
 0xfcc   :  { %2641 = vmatpush1.bf16.msra.mxu0 %v3221_v29 }
 0xfcd   :  { %2643 = vmatprep.subr.bf16.mxu0 %v3224_v30 }
 0xfd0   :  { %2645 = vmatpush1.bf16.msra.mxu0 %v3239_v41 }
 0xfd1   :  { %2647 = vmatprep.subr.bf16.mxu0 %v3242_v42 }
 0xfd4   :  { %2649 = vmatpush1.bf16.msra.mxu0 %v3257_v48 }
 0xfd5   :  { %2651 = vmatprep.subr.bf16.mxu0 %v3260_v49 }
 0xfd8   :  { %2653 = vmatpush1.bf16.msra.mxu0 %v3275_v54 }
 0xfd9   :  { %2655 = vmatprep.subr.bf16.mxu0 %v3278_v56 }
 0xfdc   :  { %2657 = vmatpush1.bf16.msra.mxu0 %v3289_v62 }
0x102d   :  { %v1459_v14 = vpop.permute.xlu0 %1458 }
0x102e   :  { %v1461_v35 = vsel %vm217_vm2, %v1455_v40, %v1459_v14 }
0x102f   :  { %v1463_v38 = vrot.slane %v1461_v35, 2 }
0x1031   :  { %1530 = vmatmul.mubr.f32.vlgmr.msra.gmra.mrb[12].mxu1 %v1463_v38 }
0x1032   :  { %2661 = vmatpush1.bf16.msra.mxu1 %v3035_v9  ;;  %1864 = vmatprep.mubr.f32.mxu1 %v2945_v7 }
0x1033   :  { %2663 = vmatprep.subr.bf16.mxu1 %v3054_v16  ;;  %v1567_v16 = vld [vmem:[#allocation6 + $0x18] sm:$0x30] }
0x1036   :  { %2665 = vmatpush1.bf16.msra.mxu1 %v3068_v21 }
0x1037   :  { %2667 = vmatprep.subr.bf16.mxu1 %v3070_v22 }
0x103a   :  { %2669 = vmatpush1.bf16.msra.mxu1 %v3087_v27 }
0x103b   :  { %2671 = vmatprep.subr.bf16.mxu1 %v3090_v28 }
0x103e   :  { %2673 = vmatpush1.bf16.msra.mxu1 %v3100_v31  ;;  %v1566_v31 = vld [vmem:[#allocation6 + $0x10] sm:$0x30] }
0x103f   :  { %2675 = vmatprep.subr.bf16.mxu1 %v3147_v61 }
0x1092   :  { %v1638_v47 = vpop.f32.mrb[14].mxu0 }
0x1093   :  { %v1640_v26 = vpop.f32.mrb[15].mxu0  ;;  %v1645_v27 = vrot.slane %v1638_v47, 4 }
0x1094   :  { %v1646_v32 = vrot.slane %v1640_v26, 4 }
0x1095   :  { %v1649_v61 = vadd.f32 %v1645_v27, %v1566_v31 }
0x1096   :  { %v1650_v46 = vadd.f32 %v1646_v32, %v1567_v16 }
0x1097   :  { %v2261_v51 = vmul.f32 -1.442695, %v1649_v61 }
0x1098   :  { %v2262_v15 = vmul.f32 -1.442695, %v1650_v46 }
0x1104   :  { %v1531_v9 = vpop.f32.mrb[12].mxu1 }
0x1105   :  { %v1533_v36 = vpop.f32.mrb[13].mxu1  ;;  %v1532_v28 = vadd.f32 %v1531_v9, %v3341_v37  ;;  %v1794_v9 = vld [vmem:[#allocation6 + $0x10] sm:$0xc0] }
0x1106   :  { %v1534_v45 = vadd.f32 %v1533_v36, %v3334_v39 }
0x1107   :  { %v2258_v50 = vmul.f32 -1.442695, %v1532_v28 }
0x1108   :  { %2861 = vtanh.f32 %v1534_v45 }
0x1109   :  { %2863 = vtanh.f32 %v1650_v46 }
0x110a   :  { %2865 = vpow2.f32 %v2258_v50 }
0x110b   :  { %2867 = vpow2.f32 %v2261_v51 }
0x1112   :  { %v2862_v21 = vpop.eup %2861 }
0x1113   :  { %1551 = vrot.lane.b32.xlu1 %v2862_v21, %s2946_s3  ;;  %v2864_v22 = vpop.eup %2863 }
0x1114   :  { %v2866_v0 = vpop.eup %2865 }
0x1115   :  { %v1542_v5 = vadd.f32 1.0, %v2866_v0  ;;  %v2868_v53 = vpop.eup %2867 }
0x1116   :  { %v1657_v57 = vadd.f32 1.0, %v2868_v53 }
0x1117   :  { %1669 = vrot.lane.b32.xlu1 %v2864_v22, %s2946_s3  ;;  %2869 = vrcp.f32 %v1542_v5 }
0x1118   :  { %2871 = vrcp.f32 %v1657_v57 }
0x1121   :  { %v2870_v44 = vpop.eup %2869 }
0x1122   :  { %v2872_v59 = vpop.eup %2871  ;;  %v1549_v2 = vmul.f32 %v2870_v44, %v3527_v17  ;;  %v2259_v17 = vmul.f32 -1.442695, %v1534_v45 }
0x1123   :  { %v1667_v34 = vmul.f32 %v2872_v59, %v1665_v4 }
0x1185   :  { %v1552_v58 = vpop.permute.xlu1 %1551 }
0x1186   :  { %v1554_v13 = vmul.f32 %v2870_v44, %v1552_v58 }
0x1188   :  { %1556 = vrot.lane.b32.xlu0 %v1554_v13, %s2946_s3 }
0x1189   :  { %v1670_v24 = vpop.permute.xlu1 %1669 }
0x118a   :  { %v1672_v63 = vmul.f32 %v2872_v59, %v1670_v24 }
0x118c   :  { %1674 = vrot.lane.b32.xlu0 %v1672_v63, %s2946_s3 }
0x11fa   :  { %v1557_v33 = vpop.permute.xlu0 %1556 }
0x11fb   :  { %v3571_v43 = vadd.f32 %v1557_v33, %v1549_v2 }
0x11fd   :  { %2873 = vtanh.f32 %v3571_v43 }
0x11fe   :  { %v1675_v55 = vpop.permute.xlu0 %1674 }
0x11ff   :  { %v3574_v3 = vadd.f32 %v1675_v55, %v1667_v34 }
0x1201   :  { %2875 = vtanh.f32 %v3574_v3  ;;  %v1893_v57 = vrot.slane %v3574_v3, 6 }
0x1202   :  { %2877 = vpow2.f32 %v2259_v17 }
0x1203   :  { %2879 = vpow2.f32 %v2262_v15 }
0x1207   :  { %v2874_v8 = vpop.eup %2873 }
0x1208   :  { %1562 = vrot.lane.b32.xlu1 %v2874_v8, %s2946_s3 }
0x120b   :  { %v2876_v10 = vpop.eup %2875 }
0x120c   :  { %1680 = vrot.lane.b32.xlu0 %v2876_v10, %s2946_s3  ;;  %v2878_v60 = vpop.eup %2877 }
0x120d   :  { %v1543_v20 = vadd.f32 1.0, %v2878_v60  ;;  %v2880_v52 = vpop.eup %2879 }
0x120e   :  { %v1658_v23 = vadd.f32 1.0, %v2880_v52 }
0x120f   :  { %2881 = vrcp.f32 %v1543_v20 }
0x1210   :  { %2883 = vrcp.f32 %v1658_v23 }
0x1219   :  { %v2882_v40 = vpop.eup %2881 }
0x121a   :  { %v2884_v38 = vpop.eup %2883 }
0x127a   :  { %v1563_v25 = vpop.permute.xlu1 %1562 }
0x127b   :  { %v1565_v14 = vmul.f32 %v2882_v40, %v1563_v25 }
0x127d   :  { %v1685_v35 = vrot.slane %v1565_v14, 4 }
0x127e   :  { %v1681_v47 = vpop.permute.xlu0 %1680 }
0x127f   :  { %v1683_v26 = vmul.f32 %v2884_v38, %v1681_v47  ;;  %1686 = vrot.lane.b32.xlu1 %v1685_v35, %s2946_s3 }
0x1281   :  { %v1797_v32 = vrot.slane %v1683_v26, 4 }
0x1283   :  { %2265 = vmatmul.mubr.msk.f32.vlgmr.msra.gmra.mrb[14].mxu1 %vm217_vm2, %v1797_v32 }
0x1284   :  { %2677 = vmatpush1.bf16.msra.mxu1 %v3158_v1  ;;  %1985 = vmatprep.mubr.f32.mxu1 %v2945_v7 }
0x1285   :  { %2679 = vmatprep.subr.bf16.mxu1 %v3170_v6 }
0x1288   :  { %2681 = vmatpush1.bf16.msra.mxu1 %v3180_v11 }
0x1289   :  { %2683 = vmatprep.subr.bf16.mxu1 %v3183_v12 }
0x128c   :  { %2685 = vmatpush1.bf16.msra.mxu1 %v3198_v18 }
0x128d   :  { %2687 = vmatprep.subr.bf16.mxu1 %v3201_v19 }
0x1290   :  { %2689 = vmatpush1.bf16.msra.mxu1 %v3221_v29 }
0x1291   :  { %2691 = vmatprep.subr.bf16.mxu1 %v3224_v30 }
0x1294   :  { %2693 = vmatpush1.bf16.msra.mxu1 %v3239_v41 }
0x1295   :  { %2695 = vmatprep.subr.bf16.mxu1 %v3242_v42  ;;  %v1795_v42 = vld [vmem:[#allocation6 + $0x18] sm:$0xc0] }
0x1298   :  { %2697 = vmatpush1.bf16.msra.mxu1 %v3257_v48 }
0x1299   :  { %2699 = vmatprep.subr.bf16.mxu1 %v3260_v49 }
0x129c   :  { %2701 = vmatpush1.bf16.msra.mxu1 %v3275_v54 }
0x129d   :  { %2703 = vmatprep.subr.bf16.mxu1 %v3278_v56 }
0x12a0   :  { %2705 = vmatpush1.bf16.msra.mxu1 %v3289_v62 }
0x12f1   :  { %v1687_v1 = vpop.permute.xlu1 %1686 }
0x12f2   :  { %v1689_v6 = vsel %vm217_vm2, %v1683_v26, %v1687_v1 }
0x12f3   :  { %v1691_v11 = vrot.slane %v1689_v6, 4 }
0x12f5   :  { %1758 = vmatmul.mubr.f32.vlgmr.msra.gmra.mrb[16].mxu0 %v1691_v11 }
0x12f6   :  { %2304 = vmatprep.mubr.msk.f32.mxu0 %vm2948_vm4, %v2945_v7 }
0x1356   :  { %v1866_v12 = vpop.f32.mrb[14].mxu1 }
0x1357   :  { %v1868_v18 = vpop.f32.mrb[15].mxu1  ;;  %v1873_v56 = vrot.slane %v1866_v12, 2 }
0x1358   :  { %v1874_v19 = vrot.slane %v1868_v18, 2  ;;  %v2041_v18 = vld [vmem:[%s3690_s6 + $0x10] sm:$0xff] }
0x1359   :  { %v1877_v36 = vadd.f32 %v1873_v56, %v1794_v9  ;;  %v2046_v56 = vld [vmem:[%s3690_s6 + $0x38] sm:$0xff] }
0x135a   :  { %v1878_v48 = vadd.f32 %v1874_v19, %v1795_v42  ;;  %v2947_v19 = vmov 0.0|0.0   ;;  %v2043_v42 = vld [vmem:[%s3690_s6 + $0x20] sm:$0xff] }
0x135b   :  { %v2266_v16 = vmul.f32 -1.442695, %v1877_v36  ;;  %2706 = vmatprep.subr.bf16.mxu0 %v2947_v19 }
0x135c   :  { %v2267_v33 = vmul.f32 -1.442695, %v1878_v48 }
0x13c8   :  { %v1759_v29 = vpop.f32.mrb[16].mxu0 }
0x13c9   :  { %v1761_v30 = vpop.f32.mrb[17].mxu0  ;;  %v1760_v62 = vadd.f32 %v1759_v29, %v3341_v37 }
0x13ca   :  { %v1762_v41 = vadd.f32 %v1761_v30, %v3334_v39  ;;  %v2042_v30 = vld [vmem:[%s3690_s6 + $0x18] sm:$0xff] }
0x13cb   :  { %v2263_v45 = vmul.f32 -1.442695, %v1760_v62 }
0x13cc   :  { %2885 = vtanh.f32 %v1762_v41  ;;  %v2264_v2 = vmul.f32 -1.442695, %v1762_v41  ;;  %v2710_v41 = vpack.c.bf16 %v2042_v30, %v2041_v18 }
0x13cd   :  { %2887 = vtanh.f32 %v1878_v48  ;;  %v2044_v48 = vld [vmem:[%s3690_s6 + $0x28] sm:$0xff] }
0x13ce   :  { %2889 = vpow2.f32 %v2263_v45 }
0x13cf   :  { %2891 = vpow2.f32 %v2266_v16 }
0x13d6   :  { %v2886_v49 = vpop.eup %2885 }
0x13d7   :  { %1779 = vrot.lane.b32.xlu0 %v2886_v49, %s2946_s3  ;;  %v2888_v54 = vpop.eup %2887  ;;  %v2713_v49 = vpack.c.bf16 %v2044_v48, %v2043_v42 }
0x13d8   :  { %v2890_v46 = vpop.eup %2889 }
0x13d9   :  { %v1770_v21 = vadd.f32 1.0, %v2890_v46  ;;  %v2892_v22 = vpop.eup %2891 }
0x13da   :  { %v1885_v27 = vadd.f32 1.0, %v2892_v22 }
0x13db   :  { %1897 = vrot.lane.b32.xlu0 %v2888_v54, %s2946_s3  ;;  %2893 = vrcp.f32 %v1770_v21  ;;  %v2045_v54 = vld [vmem:[%s3690_s6 + $0x30] sm:$0xff] }
0x13dc   :  { %2895 = vrcp.f32 %v1885_v27  ;;  %v2716_v62 = vpack.c.bf16 %v2046_v56, %v2045_v54 }
0x13e5   :  { %v2894_v28 = vpop.eup %2893 }
0x13e6   :  { %v2896_v50 = vpop.eup %2895  ;;  %v1777_v5 = vmul.f32 %v2894_v28, %v3571_v43 }
0x13e7   :  { %v1895_v58 = vmul.f32 %v2896_v50, %v1893_v57  ;;  %v2131_v57 = vld [vmem:[%s3692_s8 + $0x18] sm:$0xff] }
0x1449   :  { %v1780_v31 = vpop.permute.xlu0 %1779 }
0x144a   :  { %v1782_v61 = vmul.f32 %v2894_v28, %v1780_v31  ;;  %v2128_v28 = vld [vmem:[%s3692_s8] sm:$0xff]  ;;  %v2129_v31 = vld [vmem:[%s3692_s8 + $0x8] sm:$0xff] }
0x144c   :  { %1784 = vrot.lane.b32.xlu1 %v1782_v61, %s2946_s3 }
0x144d   :  { %v1898_v51 = vpop.permute.xlu0 %1897 }
0x144e   :  { %v1900_v0 = vmul.f32 %v2896_v50, %v1898_v51  ;;  %v2719_v51 = vpack.c.bf16 %v2129_v31, %v2128_v28 }
0x1450   :  { %1902 = vrot.lane.b32.xlu1 %v1900_v0, %s2946_s3 }
0x14be   :  { %v1785_v53 = vpop.permute.xlu1 %1784 }
0x14bf   :  { %v3606_v44 = vadd.f32 %v1785_v53, %v1777_v5  ;;  %v2130_v53 = vld [vmem:[%s3692_s8 + $0x10] sm:$0xff]  ;;  %s2921_s8 = scalar_lea.vmem %s2221_s1, 32 }
0x14c0   :  { %p2922_p0 = scmp.ne.s32.totalorder %s2221_s1, %s2921_s8  ;;  %p2927_p2 = scmp.lt.s32.totalorder %s2921_s8, %s2921_s8 }
0x14c1   :  { %2897 = vtanh.f32 %v3606_v44 }
0x14c2   :  { %v1903_v13 = vpop.permute.xlu1 %1902  ;;  %p2928_p3 = por %p2927_p2, %p2926_p1 }
0x14c3   :  { %v1905_v59 = vadd.f32 %v1903_v13, %v1895_v58  ;;  %v2270_v58 = vld [vmem:[%s3691_s7] ss:$0 sm:$0xff] }
0x14c4   :  { %p2929_p4 = pnand %p2928_p3, %p2922_p0 }
0x14c5   :  { %2899 = vtanh.f32 %v1905_v59 }
0x14c6   :  { %2901 = vpow2.f32 %v2264_v2 }
0x14c7   :  { %2903 = vpow2.f32 %v2267_v33 }
0x14cb   :  { %v2898_v24 = vpop.eup %2897 }
0x14cc   :  { %1790 = vrot.lane.b32.xlu0 %v2898_v24, %s2946_s3 }
0x14cf   :  { %v2900_v63 = vpop.eup %2899 }
0x14d0   :  { %1908 = vrot.lane.b32.xlu1 %v2900_v63, %s2946_s3  ;;  %v2902_v4 = vpop.eup %2901  ;;  %v2272_v63 = vld [vmem:[%s3693_s9] ss:$0 sm:$0xff] }
0x14d1   :  { %v1771_v43 = vadd.f32 1.0, %v2902_v4  ;;  %v2904_v34 = vpop.eup %2903 }
0x14d2   :  { %v1886_v55 = vadd.f32 1.0, %v2904_v34 }
0x14d3   :  { %2905 = vrcp.f32 %v1771_v43 }
0x14d4   :  { %2907 = vrcp.f32 %v1886_v55 }
0x14dd   :  { %v2906_v3 = vpop.eup %2905 }
0x14de   :  { %v2908_v15 = vpop.eup %2907 }
0x153e   :  { %v1791_v8 = vpop.permute.xlu0 %1790 }
0x153f   :  { %v1793_v10 = vmul.f32 %v2906_v3, %v1791_v8 }
0x1541   :  { %v1913_v17 = vrot.slane %v1793_v10, 2 }
0x1542   :  { %v1909_v60 = vpop.permute.xlu1 %1908 }
0x1543   :  { %v1911_v20 = vmul.f32 %v2908_v15, %v1909_v60  ;;  %1914 = vrot.lane.b32.xlu0 %v1913_v17, %s2946_s3 }
0x1545   :  { %2023 = vst.msk [vmem:[#allocation2 - $0x6] sm:$0xc0] %vm2022_vm3, %v1911_v20 }
0x15b5   :  { %v1915_v52 = vpop.permute.xlu0 %1914 }
0x15b6   :  { %v1917_v23 = vsel %vm217_vm2, %v1911_v20, %v1915_v52 }
0x15b7   :  { %v1919_v40 = vrot.slane %v1917_v23, 6 }
0x15b9   :  { %1986 = vmatmul.mubr.f32.vlgmr.msra.gmra.mrb[16].mxu1 %v1919_v40 }
0x168c   :  { %v1987_v25 = vpop.f32.mrb[16].mxu1 }
0x168d   :  { %v1989_v14 = vpop.f32.mrb[17].mxu1  ;;  %v1988_v47 = vadd.f32 %v1987_v25, %v3341_v37  ;;  %v2040_v37 = vld [vmem:[%s3690_s6 + $0x8] sm:$0xff] }
0x168e   :  { %v1990_v35 = vadd.f32 %v1989_v14, %v3334_v39  ;;  %v2039_v39 = vld [vmem:[%s3690_s6] sm:$0xff] }
0x168f   :  { %v2268_v26 = vmul.f32 -1.442695, %v1988_v47  ;;  %v2707_v29 = vpack.c.bf16 %v2040_v37, %v2039_v39 }
0x1690   :  { %2909 = vtanh.f32 %v1990_v35  ;;  %v2269_v21 = vmul.f32 -1.442695, %v1990_v35 }
0x1691   :  { %2911 = vpow2.f32 %v2268_v26  ;;  %2708 = vmatpush3.bf16.msra.mxu0 %v2707_v29 }
0x1692   :  { %2709 = vmatprep.subr.bf16.mxu0 %v2947_v19 }
0x1695   :  { %2711 = vmatpush3.bf16.msra.mxu0 %v2710_v41 }
0x1696   :  { %2712 = vmatprep.subr.bf16.mxu0 %v2947_v19 }
0x1699   :  { %2714 = vmatpush3.bf16.msra.mxu0 %v2713_v49 }
0x169a   :  { %v2910_v38 = vpop.eup %2909  ;;  %2715 = vmatprep.subr.bf16.mxu0 %v2947_v19 }
0x169b   :  { %2007 = vrot.lane.b32.xlu1 %v2910_v38, %s2946_s3  ;;  %v2912_v32 = vpop.eup %2911 }
0x169c   :  { %v1998_v1 = vadd.f32 1.0, %v2912_v32 }
0x169d   :  { %2717 = vmatpush3.bf16.msra.mxu0 %v2716_v62 }
0x169e   :  { %2913 = vrcp.f32 %v1998_v1  ;;  %2718 = vmatprep.subr.bf16.mxu0 %v2947_v19 }
0x16a8   :  { %v2914_v6 = vpop.eup %2913 }
0x16a9   :  { %v2005_v9 = vmul.f32 %v2914_v6, %v3606_v44  ;;  %v2722_v44 = vpack.c.bf16 %v2131_v57, %v2130_v53 }
0x170d   :  { %v2008_v11 = vpop.permute.xlu1 %2007 }
0x170e   :  { %v2010_v12 = vmul.f32 %v2914_v6, %v2008_v11 }
0x1710   :  { %2012 = vrot.lane.b32.xlu0 %v2010_v12, %s2946_s3 }
0x1714   :  { %2025 = vrot.lane.b32.xlu0 %v1905_v59, %s2946_s3 }
0x1782   :  { %v2013_v36 = vpop.permute.xlu0 %2012 }
0x1783   :  { %v2015_v45 = vadd.f32 %v2013_v36, %v2005_v9 }
0x1785   :  { %2915 = vtanh.f32 %v2015_v45 }
0x1786   :  { %v2026_v16 = vpop.permute.xlu0 %2025  ;;  %2917 = vpow2.f32 %v2269_v21 }
0x1787   :  { %2028 = vst.msk [vmem:[#allocation3 - $0x6] sm:$0xc0] %vm2022_vm3, %v2026_v16 }
0x178f   :  { %v2916_v46 = vpop.eup %2915 }
0x1790   :  { %2018 = vrot.lane.b32.xlu1 %v2916_v46, %s2946_s3  ;;  %v2918_v22 = vpop.eup %2917 }
0x1791   :  { %v1999_v27 = vadd.f32 1.0, %v2918_v22 }
0x1793   :  { %2919 = vrcp.f32 %v1999_v27 }
0x1794   :  { %2032 = vrot.lane.b32.xlu1 %v2015_v45, %s2946_s3 }
0x179d   :  { %v2920_v61 = vpop.eup %2919 }
0x1802   :  { %v2019_v50 = vpop.permute.xlu1 %2018 }
0x1803   :  { %v2021_v0 = vmul.f32 %v2920_v61, %v2019_v50 }
0x1805   :  { %2030 = vst.msk [vmem:[#allocation4] sm:$0x3] %vm40_vm0, %v2021_v0  ;;  %2305 = vmatmul.mubr.msk.f32.vlgmr.msra.gmra.mrb[18].mxu0 %vm217_vm2, %v2021_v0 }
0x1806   :  { %v2033_v5 = vpop.permute.xlu1 %2032  ;;  %2720 = vmatpush3.bf16.msra.mxu0 %v2719_v51  ;;  %2315 = vmatprep.mubr.msk.f32.mxu0 %vm2948_vm4, %v2945_v7 }
0x1807   :  { %2035 = vst.msk [vmem:[#allocation5] sm:$0x3] %vm40_vm0, %v2033_v5  ;;  %2721 = vmatprep.subr.bf16.mxu0 %v2947_v19 }
0x180a   :  { %2723 = vmatpush3.bf16.msra.mxu0 %v2722_v44 }
0x18d8   :  { %v2123_v13 = vpop.f32.mrb[18].mxu0 }
0x18d9   :  { %v2124_v59 = vadd.f32 %v2270_v58, %v2123_v13  ;;  %v2306_v7 = vpop.f32.mrb[19].mxu0 }
0x18db   :  { %v2127_v24 = vmax.f32 %v2124_v59, 0.0 }
0x18dd   :  { %2316 = vmatmul.mubr.msk.f32.vlgmr.msra.gmra.mrb[20].mxu0 %vm2139_vm5, %v2127_v24 }
0x19b0   :  { %v2209_v2 = vpop.f32.mrb[20].mxu0 }
0x19b1   :  { %v2210_v33 = vadd.f32 %v2272_v63, %v2209_v2  ;;  %v2317_v4 = vpop.f32.mrb[21].mxu0 }
0x19b3   :  { %2213 = vst [vmem:[#allocation7] sm:$0x3] %v2210_v33 }
0x19b4   :  { %2932 = shalt.err (!%p2929_p4)
}
0x19b5   :  { %s2933_s16 = scalar_lea.hbm %s3694_s10, 32 }
0x19b6   :  { %p2934_p5 = scmp.ne.s32.totalorder %s3694_s10, %s2933_s16  ;;  %p2937_p6 = scmp.lt.u32.totalorder %s2933_s16, %s3694_s10 }
0x19b8   :  { %p2939_p7 = pnand %p2937_p6, %p2934_p5 }
0x19ba   :  { %2942 = shalt.err (!%p2939_p7)
}
0x19bb   :  { %2223 = dma.vmem_to_hbm [thread:$0]  %s2221_s1, 32, %s3694_s10, [#allocation8]  }
0x19bc   :  { %2943 = dma.done.wait [#allocation8], 32  }
0x19bd   :  { %2944 = vsyncadd [#allocation8], 4294967264 }
0x19be   :  { %2227 = vsyncpa [#allocation8], 1 }

</bundles_post_ra>
